<compile_context>
chip_gen: v7x
topology: tpu7x:2x2x1
jax: 0.10.0
libtpu: 0.0.40
codegen_flags: <defaults>
</compile_context>

<pallas_src>
import functools

import jax
import jax.numpy as jnp
import numpy as np
from jax.experimental import pallas as pl
from jax.experimental.pallas import tpu as pltpu

BN_EPS = 1e-5


def init_params(key):
    ks = jax.random.split(key, 6)
    return {
        "w1": jax.random.normal(ks[0], (32, 3, 3, 3), jnp.float32) * 0.1,
        "b1": jax.random.normal(ks[1], (32,), jnp.float32) * 0.1,
        "g1": jnp.ones((32,), jnp.float32),
        "be1": jnp.zeros((32,), jnp.float32),
        "w2": jax.random.normal(ks[2], (64, 32, 3, 3), jnp.float32) * 0.05,
        "b2": jax.random.normal(ks[3], (64,), jnp.float32) * 0.05,
        "g2": jnp.ones((64,), jnp.float32),
        "be2": jnp.zeros((64,), jnp.float32),
        "w3": jax.random.normal(ks[4], (6, 64, 1, 1), jnp.float32) * 0.1,
        "b3": jax.random.normal(ks[5], (6,), jnp.float32) * 0.1,
    }


def _fused_kernel(patches_ref, w1_ref, g1_ref, be1_ref, w2_ref, mask_ref,
                  g2_ref, be2_ref, w3_ref, b3_ref, o_ref, *,
                  n_batch, hw_out, c1, c2, w_out, q_rows, m1_rows, g_rows):
    """Whole CNN_model_1 forward on one set of VMEM-resident blocks."""
    f32 = jnp.float32

    # Lane-group folds: the channel layout along lanes is periodic with period
    # c1 (4 groups x c1 = 128 lanes), so two XLU lane-rolls place the
    # per-channel total / max over the 4 groups into *every* lane.
    def fold4_sum(v):
        v = v + pltpu.roll(v, shift=2 * c1, axis=1)
        return v + pltpu.roll(v, shift=c1, axis=1)

    def fold4_max(v):
        v = jnp.maximum(v, pltpu.roll(v, shift=2 * c1, axis=1))
        return jnp.maximum(v, pltpu.roll(v, shift=c1, axis=1))

    # ---- Conv1 (3x3, pad=1): 4 pool positions packed into lanes -> ONE
    #      (Q,128)x(128,128) bf16 MXU dot with f32 accumulation.
    #      Conv bias b1 omitted: it cancels exactly inside training-mode BN.
    acc1 = jnp.dot(patches_ref[...], w1_ref[...],
                   preferred_element_type=f32)                      # (Q, 4*c1) f32

    # ---- BN1 (batch stats, biased variance; stats kept in f32) + ReLU.
    s1 = fold4_sum(jnp.sum(acc1, axis=0, keepdims=True))
    ss1 = fold4_sum(jnp.sum(acc1 * acc1, axis=0, keepdims=True))
    mean1 = s1 * (1.0 / m1_rows)
    var1 = ss1 * (1.0 / m1_rows) - mean1 * mean1
    y1 = jnp.maximum((acc1 - mean1) * jax.lax.rsqrt(var1 + BN_EPS)
                     * g1_ref[...] + be1_ref[...], 0.0)             # (Q, 4*c1)

    # ---- MaxPool2d(2): elementwise max over the 4 lane groups (XLU rolls).
    y1p = fold4_max(y1)                                             # pooled map

    # ---- Conv2 (3x3, pad=1) as ONE (Q, 9*c1) x (9*c1, c2) MXU dot.  The 9 tap
    #      copies are register-level row rotations (pltpu.roll, XLU slot);
    #      image / zero-padding boundaries handled by a single precomputed
    #      (Q, 9*c1) 0/1 mask multiply.  Conv bias b2 omitted (cancels in BN2).
    pieces = []
    for kh in range(3):
        for kw in range(3):
            shift = (kh - 1) * w_out + (kw - 1)       # flat-row offset of this tap
            src = y1p if shift == 0 else pltpu.roll(
                y1p, shift=(-shift) % q_rows, axis=0)
            pieces.append(src[:, :c1])
    slab = jnp.concatenate(pieces, axis=1).astype(jnp.bfloat16) * mask_ref[...]
    acc2 = jnp.dot(slab, w2_ref[...], preferred_element_type=f32)   # (Q, c2) f32

    # ---- BN2 + ReLU (f32 stats).
    s2 = jnp.sum(acc2, axis=0, keepdims=True)
    ss2 = jnp.sum(acc2 * acc2, axis=0, keepdims=True)
    mean2 = s2 * (1.0 / q_rows)
    var2 = ss2 * (1.0 / q_rows) - mean2 * mean2
    y2 = jnp.maximum((acc2 - mean2) * jax.lax.rsqrt(var2 + BN_EPS)
                     * g2_ref[...] + be2_ref[...], 0.0)             # (Q, c2)

    # ---- AdaptiveMaxPool2d(1): one vectorized per-image reduction (no loop,
    #      no scratch), zero-padded to g_rows for a full output tile.
    gmax = jnp.max(y2.reshape(n_batch, hw_out, c2), axis=1)         # (N, c2)
    if g_rows > n_batch:
        gmax = jnp.concatenate(
            [gmax, jnp.zeros((g_rows - n_batch, c2), f32)], axis=0)

    # ---- Conv2d(c2 -> 6, k=1) + Flatten.  Tiny dot kept in f32; store is an
    #      unmasked full (g_rows, 128) tile (wrapper slices [:N, :6]).
    o_ref[...] = jnp.dot(gmax, w3_ref[...],
                         preferred_element_type=f32) + b3_ref[...]


def cnn_model_1_forward(x_nchw, p):
    """Forward pass of CNN_model_1 as a single fused Pallas TPU kernel."""
    N, C_in, H, W = x_nchw.shape
    assert H % 2 == 0 and W % 2 == 0, "MaxPool2d(2) path assumes even H, W"
    Ho, Wo = H // 2, W // 2
    HoWo = Ho * Wo
    Q = N * HoWo                          # rows after the 2x2 max pool
    M1 = N * H * W                        # conv1 output positions (BN1 count)
    C1 = p["w1"].shape[0]                 # 32
    C2 = p["w2"].shape[0]                 # 64
    C_out = p["w3"].shape[0]              # 6
    K1 = C_in * 9                         # 27
    K1p = 32                              # per-pool-position patch pad (27 -> 32)
    assert K1 <= K1p and 4 * K1p == 128 and 4 * C1 == 128
    C_out_pad = 128                       # lane-dense final store
    G = max(8, -(-N // 8) * 8)            # sublane-aligned output rows

    # ------- one-time XLA-side layout plumbing (bf16; the (n,ho,wo)/pool-pos
    #         reorder is folded directly into the tap stacking) ---------------
    xh = jnp.transpose(x_nchw, (0, 2, 3, 1)).astype(jnp.bfloat16)    # NHWC bf16
    xp = jnp.pad(xh, ((0, 0), (1, 1), (1, 1), (0, 0)))
    taps = [xp[:, kh:kh + H, kw:kw + W, :] for kh in range(3) for kw in range(3)]
    pt = jnp.stack(taps, axis=-1)                                    # (N,H,W,C,9)
    # rows -> (n,ho,wo); lanes -> (pool_pos = dh*2+dw, c*9 + kh*3+kw) pad to 4*32
    pt = jnp.transpose(pt.reshape(N, Ho, 2, Wo, 2, C_in, 9),
                       (0, 1, 3, 2, 4, 5, 6))
    pt = pt.reshape(Q, 4, K1)
    patches1 = jnp.pad(pt, ((0, 0), (0, 0), (0, K1p - K1))).reshape(Q, 4 * K1p)

    # conv1 weight: (K1p, C1) block repeated block-diagonally (one per pool pos)
    w1m = jnp.pad(p["w1"].reshape(C1, K1).T, ((0, K1p - K1), (0, 0)))      # (32,32)
    w1blk = jnp.kron(jnp.eye(4, dtype=jnp.float32), w1m).astype(jnp.bfloat16)
    g1t = jnp.tile(p["g1"], 4)[None, :]                                    # (1,128)
    be1t = jnp.tile(p["be1"], 4)[None, :]

    # conv2 weight: (9*C1, C2), rows ordered (tap = kh*3+kw, c_in)
    w2cat = jnp.transpose(p["w2"], (2, 3, 1, 0)).reshape(9 * C1, C2)
    w2cat = w2cat.astype(jnp.bfloat16)

    # conv2 zero-padding boundary mask, pre-expanded to the (Q, 9*C1) slab
    hh, ww = np.meshgrid(np.arange(Ho), np.arange(Wo), indexing="ij")
    h_flat = np.tile(hh.reshape(-1), N)
    w_flat = np.tile(ww.reshape(-1), N)
    mask9 = np.zeros((Q, 9), np.float32)
    for kh in range(3):
        for kw in range(3):
            ok = ((h_flat + kh - 1 >= 0) & (h_flat + kh - 1 < Ho) &
                  (w_flat + kw - 1 >= 0) & (w_flat + kw - 1 < Wo))
            mask9[:, kh * 3 + kw] = ok
    mask288 = jnp.asarray(np.repeat(mask9, C1, axis=1), jnp.bfloat16)      # (Q,288)

    g2r = p["g2"][None, :]
    be2r = p["be2"][None, :]
    w3m = jnp.pad(p["w3"].reshape(C_out, C2).T,
                  ((0, 0), (0, C_out_pad - C_out)))                        # (C2,128)
    b3p = jnp.pad(p["b3"][None, :], ((0, 0), (0, C_out_pad - C_out)))      # (1,128)

    kernel = functools.partial(
        _fused_kernel, n_batch=N, hw_out=HoWo, c1=C1, c2=C2, w_out=Wo,
        q_rows=Q, m1_rows=M1, g_rows=G)

    # TODO(synk): at realistic N*H*W (and on v7x's 2 TensorCores / 64 MiB VMEM)
    # tile the Q axis with a ("parallel",) grid -- constant-index weight
    # BlockSpecs, cross-tile (two-pass) BN statistics -- and gather the conv1
    # taps in-kernel instead of the wrapper im2col; at this toy size a single
    # grid-less fused invocation with whole-array VMEM blocks is fastest.
    out_pad = pl.pallas_call(
        kernel,
        out_shape=jax.ShapeDtypeStruct((G, C_out_pad), jnp.float32),
        compiler_params=pltpu.CompilerParams(vmem_limit_bytes=32 * 1024 * 1024),
    )(patches1, w1blk, g1t, be1t, w2cat, mask288, g2r, be2r, w3m, b3p)

    return out_pad[:N, :C_out]


# ------------------------------------------------------------------------------
# Pure-JAX reference (independent path via lax.conv, biases included) for
# validation.  The kernel drops b1/b2 because they cancel exactly inside
# training-mode BatchNorm; matching this reference proves that claim.
# ------------------------------------------------------------------------------
def reference(x_nchw, p):
    def conv(x, w, b, pad):
        y = jax.lax.conv_general_dilated(
            x, w, (1, 1), [(pad, pad), (pad, pad)],
            dimension_numbers=("NCHW", "OIHW", "NCHW"),
            precision=jax.lax.Precision.HIGHEST)
        return y + b[None, :, None, None]

    def bn(x, g, be):
        mean = x.mean(axis=(0, 2, 3), keepdims=True)
        var = ((x - mean) ** 2).mean(axis=(0, 2, 3), keepdims=True)
        return (x - mean) / jnp.sqrt(var + BN_EPS) * g[None, :, None, None] \
            + be[None, :, None, None]

    y = jax.nn.relu(bn(conv(x_nchw, p["w1"], p["b1"], 1), p["g1"], p["be1"]))
    N, C, H, W = y.shape
    y = y.reshape(N, C, H // 2, 2, W // 2, 2).max(axis=(3, 5))
    y = jax.nn.relu(bn(conv(y, p["w2"], p["b2"], 1), p["g2"], p["be2"]))
    y = y.max(axis=(2, 3))                                        # (N, 64)
    return jnp.dot(y, p["w3"].reshape(6, 64).T,
                   precision=jax.lax.Precision.HIGHEST) + p["b3"]


if __name__ == "__main__":
    key = jax.random.PRNGKey(0)
    k_params, k_x = jax.random.split(key)
    params = init_params(k_params)
    x = jax.random.normal(k_x, (2, 3, 16, 16), jnp.float32)       # NCHW, as in PyTorch

    fwd = jax.jit(cnn_model_1_forward)
    out = jax.block_until_ready(fwd(x, params))
    assert out.shape == (2, 6), out.shape

    ref = jax.block_until_ready(reference(x, params))
    # Matmul operands are bf16 (per perf review) with f32 accumulation and f32
    # BN statistics; the reference runs at Precision.HIGHEST, so allow a
    # bf16-operand-level tolerance.
    np.testing.assert_allclose(np.asarray(out), np.asarray(ref), rtol=2e-2, atol=2e-2)

    print("KERNEL_OK")
</pallas_src>

<mosaic_0001>
module attributes {stable_mosaic.version = 11 : i64} {
  func.func @_fused_kernel(%arg0: memref<128x128xbf16, #tpu.memory_space<vmem>>, %arg1: memref<128x128xbf16, #tpu.memory_space<vmem>>, %arg2: memref<1x128xf32, #tpu.memory_space<vmem>>, %arg3: memref<1x128xf32, #tpu.memory_space<vmem>>, %arg4: memref<288x64xbf16, #tpu.memory_space<vmem>>, %arg5: memref<128x288xbf16, #tpu.memory_space<vmem>>, %arg6: memref<1x64xf32, #tpu.memory_space<vmem>>, %arg7: memref<1x64xf32, #tpu.memory_space<vmem>>, %arg8: memref<64x128xf32, #tpu.memory_space<vmem>>, %arg9: memref<1x128xf32, #tpu.memory_space<vmem>>, %arg10: memref<8x128xf32, #tpu.memory_space<vmem>>) attributes {dimension_semantics = [], scalar_prefetch = 0 : i64, scratch_operands = 0 : i64, tpu.core_type = #tpu.core_type<tc>} {
    %c0 = arith.constant 0 : index
    %c0_0 = arith.constant 0 : index
    %0 = vector.load %arg0[%c0, %c0_0] : memref<128x128xbf16, #tpu.memory_space<vmem>>, vector<128x128xbf16>
    %c0_1 = arith.constant 0 : index
    %c0_2 = arith.constant 0 : index
    %1 = vector.load %arg1[%c0_1, %c0_2] : memref<128x128xbf16, #tpu.memory_space<vmem>>, vector<128x128xbf16>
    %cst = arith.constant dense<0.000000e+00> : vector<128x128xf32>
    %2 = tpu.matmul %0, %1, %cst {dimension_numbers = #tpu.dot_dimension_numbers<[1], [0], [0], [1], [0, 0, 1, 1], [], []>} : vector<128x128xbf16>, vector<128x128xbf16>, vector<128x128xf32> -> vector<128x128xf32>
    %cst_3 = arith.constant dense<0.000000e+00> : vector<128xf32>
    %3 = vector.multi_reduction <add>, %2, %cst_3 [0] : vector<128x128xf32> to vector<128xf32>
    %4 = vector.shape_cast %3 : vector<128xf32> to vector<1x128xf32>
    %c64_i32 = arith.constant 64 : i32
    %5 = tpu.dynamic_rotate %4 by %c64_i32 dim 1 : vector<1x128xf32>, i32 -> vector<1x128xf32>
    %6 = arith.addf %4, %5 : vector<1x128xf32>
    %c32_i32 = arith.constant 32 : i32
    %7 = tpu.dynamic_rotate %6 by %c32_i32 dim 1 : vector<1x128xf32>, i32 -> vector<1x128xf32>
    %8 = arith.addf %6, %7 : vector<1x128xf32>
    %9 = arith.mulf %2, %2 : vector<128x128xf32>
    %cst_4 = arith.constant dense<0.000000e+00> : vector<128xf32>
    %10 = vector.multi_reduction <add>, %9, %cst_4 [0] : vector<128x128xf32> to vector<128xf32>
    %11 = vector.shape_cast %10 : vector<128xf32> to vector<1x128xf32>
    %c64_i32_5 = arith.constant 64 : i32
    %12 = tpu.dynamic_rotate %11 by %c64_i32_5 dim 1 : vector<1x128xf32>, i32 -> vector<1x128xf32>
    %13 = arith.addf %11, %12 : vector<1x128xf32>
    %c32_i32_6 = arith.constant 32 : i32
    %14 = tpu.dynamic_rotate %13 by %c32_i32_6 dim 1 : vector<1x128xf32>, i32 -> vector<1x128xf32>
    %15 = arith.addf %13, %14 : vector<1x128xf32>
    %cst_7 = arith.constant 0.001953125 : f32
    %16 = vector.broadcast %cst_7 : f32 to vector<1x128xf32>
    %17 = arith.mulf %8, %16 : vector<1x128xf32>
    %cst_8 = arith.constant 0.001953125 : f32
    %18 = vector.broadcast %cst_8 : f32 to vector<1x128xf32>
    %19 = arith.mulf %15, %18 : vector<1x128xf32>
    %20 = arith.mulf %17, %17 : vector<1x128xf32>
    %21 = arith.subf %19, %20 : vector<1x128xf32>
    %22 = vector.broadcast %17 : vector<1x128xf32> to vector<128x128xf32>
    %23 = arith.subf %2, %22 : vector<128x128xf32>
    %cst_9 = arith.constant 9.99999974E-6 : f32
    %24 = vector.broadcast %cst_9 : f32 to vector<1x128xf32>
    %25 = arith.addf %21, %24 : vector<1x128xf32>
    %26 = math.rsqrt %25 : vector<1x128xf32>
    %27 = vector.broadcast %26 : vector<1x128xf32> to vector<128x128xf32>
    %28 = arith.mulf %23, %27 : vector<128x128xf32>
    %c0_10 = arith.constant 0 : index
    %c0_11 = arith.constant 0 : index
    %29 = vector.load %arg2[%c0_10, %c0_11] : memref<1x128xf32, #tpu.memory_space<vmem>>, vector<1x128xf32>
    %30 = vector.broadcast %29 : vector<1x128xf32> to vector<128x128xf32>
    %31 = arith.mulf %28, %30 : vector<128x128xf32>
    %c0_12 = arith.constant 0 : index
    %c0_13 = arith.constant 0 : index
    %32 = vector.load %arg3[%c0_12, %c0_13] : memref<1x128xf32, #tpu.memory_space<vmem>>, vector<1x128xf32>
    %33 = vector.broadcast %32 : vector<1x128xf32> to vector<128x128xf32>
    %34 = arith.addf %31, %33 : vector<128x128xf32>
    %cst_14 = arith.constant 0.000000e+00 : f32
    %35 = vector.broadcast %cst_14 : f32 to vector<128x128xf32>
    %36 = arith.maximumf %34, %35 : vector<128x128xf32>
    %c64_i32_15 = arith.constant 64 : i32
    %37 = tpu.dynamic_rotate %36 by %c64_i32_15 dim 1 : vector<128x128xf32>, i32 -> vector<128x128xf32>
    %38 = arith.maximumf %36, %37 : vector<128x128xf32>
    %c32_i32_16 = arith.constant 32 : i32
    %39 = tpu.dynamic_rotate %38 by %c32_i32_16 dim 1 : vector<128x128xf32>, i32 -> vector<128x128xf32>
    %40 = arith.maximumf %38, %39 : vector<128x128xf32>
    %c9_i32 = arith.constant 9 : i32
    %41 = tpu.dynamic_rotate %40 by %c9_i32 dim 0 : vector<128x128xf32>, i32 -> vector<128x128xf32>
    %42 = vector.extract_strided_slice %41 {offsets = [0, 0], sizes = [128, 32], strides = [1, 1]} : vector<128x128xf32> to vector<128x32xf32>
    %c8_i32 = arith.constant 8 : i32
    %43 = tpu.dynamic_rotate %40 by %c8_i32 dim 0 : vector<128x128xf32>, i32 -> vector<128x128xf32>
    %44 = vector.extract_strided_slice %43 {offsets = [0, 0], sizes = [128, 32], strides = [1, 1]} : vector<128x128xf32> to vector<128x32xf32>
    %c7_i32 = arith.constant 7 : i32
    %45 = tpu.dynamic_rotate %40 by %c7_i32 dim 0 : vector<128x128xf32>, i32 -> vector<128x128xf32>
    %46 = vector.extract_strided_slice %45 {offsets = [0, 0], sizes = [128, 32], strides = [1, 1]} : vector<128x128xf32> to vector<128x32xf32>
    %c1_i32 = arith.constant 1 : i32
    %47 = tpu.dynamic_rotate %40 by %c1_i32 dim 0 : vector<128x128xf32>, i32 -> vector<128x128xf32>
    %48 = vector.extract_strided_slice %47 {offsets = [0, 0], sizes = [128, 32], strides = [1, 1]} : vector<128x128xf32> to vector<128x32xf32>
    %49 = vector.extract_strided_slice %40 {offsets = [0, 0], sizes = [128, 32], strides = [1, 1]} : vector<128x128xf32> to vector<128x32xf32>
    %c127_i32 = arith.constant 127 : i32
    %50 = tpu.dynamic_rotate %40 by %c127_i32 dim 0 : vector<128x128xf32>, i32 -> vector<128x128xf32>
    %51 = vector.extract_strided_slice %50 {offsets = [0, 0], sizes = [128, 32], strides = [1, 1]} : vector<128x128xf32> to vector<128x32xf32>
    %c121_i32 = arith.constant 121 : i32
    %52 = tpu.dynamic_rotate %40 by %c121_i32 dim 0 : vector<128x128xf32>, i32 -> vector<128x128xf32>
    %53 = vector.extract_strided_slice %52 {offsets = [0, 0], sizes = [128, 32], strides = [1, 1]} : vector<128x128xf32> to vector<128x32xf32>
    %c120_i32 = arith.constant 120 : i32
    %54 = tpu.dynamic_rotate %40 by %c120_i32 dim 0 : vector<128x128xf32>, i32 -> vector<128x128xf32>
    %55 = vector.extract_strided_slice %54 {offsets = [0, 0], sizes = [128, 32], strides = [1, 1]} : vector<128x128xf32> to vector<128x32xf32>
    %c119_i32 = arith.constant 119 : i32
    %56 = tpu.dynamic_rotate %40 by %c119_i32 dim 0 : vector<128x128xf32>, i32 -> vector<128x128xf32>
    %57 = vector.extract_strided_slice %56 {offsets = [0, 0], sizes = [128, 32], strides = [1, 1]} : vector<128x128xf32> to vector<128x32xf32>
    %58 = tpu.concatenate %42, %44, %46, %48, %49, %51, %53, %55, %57 in 1 : vector<128x32xf32>, vector<128x32xf32>, vector<128x32xf32>, vector<128x32xf32>, vector<128x32xf32>, vector<128x32xf32>, vector<128x32xf32>, vector<128x32xf32>, vector<128x32xf32> -> vector<128x288xf32>
    %59 = arith.truncf %58 : vector<128x288xf32> to vector<128x288xbf16>
    %c0_17 = arith.constant 0 : index
    %c0_18 = arith.constant 0 : index
    %60 = vector.load %arg5[%c0_17, %c0_18] : memref<128x288xbf16, #tpu.memory_space<vmem>>, vector<128x288xbf16>
    %61 = arith.mulf %59, %60 : vector<128x288xbf16>
    %c0_19 = arith.constant 0 : index
    %c0_20 = arith.constant 0 : index
    %62 = vector.load %arg4[%c0_19, %c0_20] : memref<288x64xbf16, #tpu.memory_space<vmem>>, vector<288x64xbf16>
    %cst_21 = arith.constant dense<0.000000e+00> : vector<128x64xf32>
    %63 = tpu.matmul %61, %62, %cst_21 {dimension_numbers = #tpu.dot_dimension_numbers<[1], [0], [0], [1], [0, 0, 1, 1], [], []>} : vector<128x288xbf16>, vector<288x64xbf16>, vector<128x64xf32> -> vector<128x64xf32>
    %cst_22 = arith.constant dense<0.000000e+00> : vector<64xf32>
    %64 = vector.multi_reduction <add>, %63, %cst_22 [0] : vector<128x64xf32> to vector<64xf32>
    %65 = vector.shape_cast %64 : vector<64xf32> to vector<1x64xf32>
    %66 = arith.mulf %63, %63 : vector<128x64xf32>
    %cst_23 = arith.constant dense<0.000000e+00> : vector<64xf32>
    %67 = vector.multi_reduction <add>, %66, %cst_23 [0] : vector<128x64xf32> to vector<64xf32>
    %68 = vector.shape_cast %67 : vector<64xf32> to vector<1x64xf32>
    %cst_24 = arith.constant 7.812500e-03 : f32
    %69 = vector.broadcast %cst_24 : f32 to vector<1x64xf32>
    %70 = arith.mulf %65, %69 : vector<1x64xf32>
    %cst_25 = arith.constant 7.812500e-03 : f32
    %71 = vector.broadcast %cst_25 : f32 to vector<1x64xf32>
    %72 = arith.mulf %68, %71 : vector<1x64xf32>
    %73 = arith.mulf %70, %70 : vector<1x64xf32>
    %74 = arith.subf %72, %73 : vector<1x64xf32>
    %75 = vector.broadcast %70 : vector<1x64xf32> to vector<128x64xf32>
    %76 = arith.subf %63, %75 : vector<128x64xf32>
    %cst_26 = arith.constant 9.99999974E-6 : f32
    %77 = vector.broadcast %cst_26 : f32 to vector<1x64xf32>
    %78 = arith.addf %74, %77 : vector<1x64xf32>
    %79 = math.rsqrt %78 : vector<1x64xf32>
    %80 = vector.broadcast %79 : vector<1x64xf32> to vector<128x64xf32>
    %81 = arith.mulf %76, %80 : vector<128x64xf32>
    %c0_27 = arith.constant 0 : index
    %c0_28 = arith.constant 0 : index
    %82 = vector.load %arg6[%c0_27, %c0_28] : memref<1x64xf32, #tpu.memory_space<vmem>>, vector<1x64xf32>
    %83 = vector.broadcast %82 : vector<1x64xf32> to vector<128x64xf32>
    %84 = arith.mulf %81, %83 : vector<128x64xf32>
    %c0_29 = arith.constant 0 : index
    %c0_30 = arith.constant 0 : index
    %85 = vector.load %arg7[%c0_29, %c0_30] : memref<1x64xf32, #tpu.memory_space<vmem>>, vector<1x64xf32>
    %86 = vector.broadcast %85 : vector<1x64xf32> to vector<128x64xf32>
    %87 = arith.addf %84, %86 : vector<128x64xf32>
    %cst_31 = arith.constant 0.000000e+00 : f32
    %88 = vector.broadcast %cst_31 : f32 to vector<128x64xf32>
    %89 = arith.maximumf %87, %88 : vector<128x64xf32>
    %90 = vector.shape_cast %89 : vector<128x64xf32> to vector<2x64x64xf32>
    %cst_32 = arith.constant dense<0xFF800000> : vector<2x64xf32>
    %91 = vector.multi_reduction <maximumf>, %90, %cst_32 [1] : vector<2x64x64xf32> to vector<2x64xf32>
    %cst_33 = arith.constant 0.000000e+00 : f32
    %92 = vector.broadcast %cst_33 : f32 to vector<6x64xf32>
    %93 = tpu.concatenate %91, %92 in 0 : vector<2x64xf32>, vector<6x64xf32> -> vector<8x64xf32>
    %c0_34 = arith.constant 0 : index
    %c0_35 = arith.constant 0 : index
    %94 = vector.load %arg8[%c0_34, %c0_35] : memref<64x128xf32, #tpu.memory_space<vmem>>, vector<64x128xf32>
    %cst_36 = arith.constant dense<0.000000e+00> : vector<8x128xf32>
    %95 = tpu.matmul %93, %94, %cst_36 {dimension_numbers = #tpu.dot_dimension_numbers<[1], [0], [0], [1], [0, 0, 1, 1], [], []>} : vector<8x64xf32>, vector<64x128xf32>, vector<8x128xf32> -> vector<8x128xf32>
    %c0_37 = arith.constant 0 : index
    %c0_38 = arith.constant 0 : index
    %96 = vector.load %arg9[%c0_37, %c0_38] : memref<1x128xf32, #tpu.memory_space<vmem>>, vector<1x128xf32>
    %97 = vector.broadcast %96 : vector<1x128xf32> to vector<8x128xf32>
    %98 = arith.addf %95, %97 : vector<8x128xf32>
    %c0_39 = arith.constant 0 : index
    %c0_40 = arith.constant 0 : index
    %99 = vector.load %arg10[%c0_39, %c0_40] : memref<8x128xf32, #tpu.memory_space<vmem>>, vector<8x128xf32>
    tpu.vector_store %arg10[%c0_39, %c0_40], %98 {strides = array<i32>} : memref<8x128xf32, #tpu.memory_space<vmem>>, vector<8x128xf32>,
    return
  }
}

</mosaic_0001>

<bundles_post_ra>
// kernel: tile.13
= control target key start
LH: loop header
LB: loop body
LE: loop exit
PB: predicated region body
PF: predicated region fallthrough
CT: control target
= control target key end

     0   :  { %s22_s0 = inlined_call_operand.vmem [shape: f32[32], index: 0, kind: input, shape index: {}]   ;;  %s23_s1 = inlined_call_operand.vmem [shape: f32[4,32], index: 1, kind: output, shape index: {}]  }
   0x1   :  { %v4_v0 = vld [vmem:[%s22_s0] ss:$0 sm:$0xff] }
   0x2   :  { %5 = vst [vmem:[%s23_s1] sm:$0xf] %v4_v0 }

// kernel: tile.14
= control target key start
LH: loop header
LB: loop body
LE: loop exit
PB: predicated region body
PF: predicated region fallthrough
CT: control target
= control target key end

     0   :  { %vm7_vm0 = vcmask 261120   ;;  %s37_s8 = smov 32   ;;  %s38_s9 = smov 64   ;;  %vm13_vm1 = vcmask 1048320   ;;  %vm19_vm2 = vcmask 785920   ;;  %vm25_vm3 = vcmask 523520   ;;  %s55_s0 = inlined_call_operand.vmem [shape: f32[4,32], index: 0, kind: input, shape index: {}]   ;;  %s56_s1 = inlined_call_operand.vmem [shape: f32[1,128], index: 1, kind: output, shape index: {}]  }
   0x1   :  { %v4_v0 = vld [vmem:[%s55_s0] sm:$0xf]  ;;  %s36_s0 = smov 96  }
   0x2   :  { %5 = vst [vmem:[#allocation1] sm:$0xf] %v4_v0 }
   0x9   :  { %v10_v1 = vld [vmem:[#allocation1 + $0x3] sm:$0x1]   ;;  %v22_v2 = vld [vmem:[#allocation1 + $0x1] sm:$0x1]   ;;  %v6_v3 = vld [vmem:[#allocation1] sm:$0x1]  }
   0xa   :  { %11 = vrot.lane.b32.xlu0 %v10_v1, %s36_s0  ;;  %23 = vrot.lane.b32.xlu1 %v22_v2, %s37_s8  ;;  %v16_v4 = vld [vmem:[#allocation1 + $0x2] sm:$0x1]   ;;  %8 = vst.msk [vmem:[#allocation0] sm:$0x1] %vm7_vm0, %v6_v3  }
   0xe   :  { %17 = vrot.lane.b32.xlu0 %v16_v4, %s38_s9 }
  0x7c   :  { %v12_v5 = vpop.permute.xlu0 %11   ;;  %v24_v6 = vpop.permute.xlu1 %23  }
  0x7d   :  { %14 = vst.msk [vmem:[#allocation0] sm:$0x1] %vm13_vm1, %v12_v5  }
  0x80   :  { %v18_v7 = vpop.permute.xlu0 %17  }
  0x81   :  { %20 = vst.msk [vmem:[#allocation0] sm:$0x1] %vm19_vm2, %v18_v7  }
  0x82   :  { %26 = vst.msk [vmem:[#allocation0] sm:$0x1] %vm25_vm3, %v24_v6  }
  0x89   :  { %v30_v8 = vld [vmem:[#allocation0] sm:$0x1] }
  0x8a   :  { %32 = vst [vmem:[%s56_s1] sm:$0x1] %v30_v8 }

// kernel: cnn_model_1_forward.1
= control target key start
LH: loop header
LB: loop body
LE: loop exit
PB: predicated region body
PF: predicated region fallthrough
CT: control target
= control target key end

     0   :  { %s2591_s24 = smov 32   ;;  %s2592_s13 = smov 96   ;;  %vm939_vm1 = vcmask 261120   ;;  %vm956_vm3 = vcmask 523264   ;;  %vm973_vm4 = vcmask 785408   ;;  %vm2594_vm5 = vmmov 0   ;;  %s3962_s1 = inlined_call_operand.vmem [shape: bf16[128,128], index: 1, kind: input, shape index: {}]   ;;  %s3963_s0 = inlined_call_operand.vmem [shape: bf16[128,128], index: 0, kind: input, shape index: {}]   ;;  %s3964_s2 = inlined_call_operand.vmem [shape: f32[1,128], index: 2, kind: input, shape index: {}]   ;;  %s3965_s3 = inlined_call_operand.vmem [shape: f32[1,128], index: 3, kind: input, shape index: {}]   ;;  %s3966_s4 = inlined_call_operand.vmem [shape: bf16[288,64], index: 4, kind: input, shape index: {}]   ;;  %s3967_s5 = inlined_call_operand.vmem [shape: bf16[128,288], index: 5, kind: input, shape index: {}]   ;;  %s3968_s8 = inlined_call_operand.vmem [shape: f32[64,128], index: 8, kind: input, shape index: {}]   ;;  %s3969_s6 = inlined_call_operand.vmem [shape: f32[1,64], index: 6, kind: input, shape index: {}]   ;;  %s3970_s7 = inlined_call_operand.vmem [shape: f32[1,64], index: 7, kind: input, shape index: {}]   ;;  %s3971_s9 = inlined_call_operand.vmem [shape: f32[1,128], index: 9, kind: input, shape index: {}]   ;;  %s3972_s10 = inlined_call_operand.vmem [shape: f32[8,128], index: 10, kind: output, shape index: {}]  }
   0x1   :  { %v2520_v0 = vld [vmem:[%s3962_s1] sm:$0xff]   ;;  %v2521_v1 = vld [vmem:[%s3962_s1 + $0x8] sm:$0xff]   ;;  %v2522_v2 = vld [vmem:[%s3962_s1 + $0x10] sm:$0xff]   ;;  %vm1842_vm6 = vcmask 1041409   ;;  %vm1845_vm7 = vcmask 1041408  }
   0x2   :  { %2111 = vmatprep.subr.bf16.mxu0 %v2520_v0  ;;  %v2523_v3 = vld [vmem:[%s3962_s1 + $0x18] sm:$0xff]   ;;  %v2528_v4 = vld [vmem:[%s3963_s0] sm:$0xff]   ;;  %v2525_v6 = vld [vmem:[%s3962_s1 + $0x28] sm:$0xff]  }
   0x3   :  { %2112 = vmatpush3.bf16.msra.mxu0 %v2520_v0  ;;  %2127 = vmatprep.mubr.bf16.mxu0 %v2528_v4  ;;  %v2524_v5 = vld [vmem:[%s3962_s1 + $0x20] sm:$0xff]   ;;  %v2526_v7 = vld [vmem:[%s3962_s1 + $0x30] sm:$0xff]   ;;  %v2527_v8 = vld [vmem:[%s3962_s1 + $0x38] sm:$0xff]  }
   0x4   :  { %2113 = vmatprep.subr.bf16.mxu0 %v2521_v1  ;;  %v2529_v9 = vld [vmem:[%s3963_s0 + $0x8] sm:$0xff]   ;;  %v2530_v10 = vld [vmem:[%s3963_s0 + $0x10] sm:$0xff]   ;;  %v2531_v11 = vld [vmem:[%s3963_s0 + $0x18] sm:$0xff]  }
   0x5   :  { %v2532_v12 = vld [vmem:[%s3963_s0 + $0x20] sm:$0xff]   ;;  %v2533_v13 = vld [vmem:[%s3963_s0 + $0x28] sm:$0xff]   ;;  %v2534_v14 = vld [vmem:[%s3963_s0 + $0x30] sm:$0xff]  }
   0x6   :  { %v2535_v15 = vld [vmem:[%s3963_s0 + $0x38] sm:$0xff]   ;;  %s2590_s0 = smov 64  }
   0x7   :  { %2114 = vmatpush3.bf16.msra.mxu0 %v2521_v1 }
   0x8   :  { %2115 = vmatprep.subr.bf16.mxu0 %v2522_v2 }
   0xb   :  { %2116 = vmatpush3.bf16.msra.mxu0 %v2522_v2 }
   0xc   :  { %2117 = vmatprep.subr.bf16.mxu0 %v2523_v3 }
   0xf   :  { %2118 = vmatpush3.bf16.msra.mxu0 %v2523_v3 }
  0x10   :  { %2119 = vmatprep.subr.bf16.mxu0 %v2524_v5 }
  0x13   :  { %2120 = vmatpush3.bf16.msra.mxu0 %v2524_v5 }
  0x14   :  { %2121 = vmatprep.subr.bf16.mxu0 %v2525_v6 }
  0x17   :  { %2122 = vmatpush3.bf16.msra.mxu0 %v2525_v6 }
  0x18   :  { %2123 = vmatprep.subr.bf16.mxu0 %v2526_v7 }
  0x1b   :  { %2124 = vmatpush3.bf16.msra.mxu0 %v2526_v7 }
  0x1c   :  { %2125 = vmatprep.subr.bf16.mxu0 %v2527_v8 }
  0x1f   :  { %2126 = vmatpush3.bf16.msra.mxu0 %v2527_v8 }
  0x22   :  { %2128 = vmatmul.mubr.bf16.vlgmr.msra.gmra.mrb[0].mxu0 %v2529_v9 }
  0x23   :  { %2131 = vmatprep.mubr.bf16.mxu0 %v2530_v10 }
  0x2a   :  { %2132 = vmatmul.mubr.bf16.gmra.mrb[4].mxu0 %v2531_v11 }
  0x2b   :  { %2135 = vmatprep.mubr.bf16.mxu0 %v2532_v12 }
  0x32   :  { %2136 = vmatmul.mubr.bf16.gmra.mrb[8].mxu0 %v2533_v13 }
  0x33   :  { %2139 = vmatprep.mubr.bf16.mxu0 %v2534_v14 }
  0x3a   :  { %2140 = vmatmul.mubr.bf16.gmra.mrb[12].mxu0 %v2535_v15 }
  0xf5   :  { %v2699_v16 = vpop.f32.mrb[0].mxu0 }
  0xf6   :  { %v2701_v17 = vpop.f32.mrb[1].mxu0  ;;  %v290_v23 = vmul.f32 %v2699_v16, %v2699_v16 }
  0xf7   :  { %v2703_v18 = vpop.f32.mrb[2].mxu0  ;;  %v288_v20 = vmul.f32 %v2701_v17, %v2701_v17 }
  0xf8   :  { %v2705_v19 = vpop.f32.mrb[3].mxu0  ;;  %v291_v26 = vmul.f32 %v2703_v18, %v2703_v18 }
  0xf9   :  { %v261_v21 = vadd.f32 %v2705_v19, %v2701_v17  ;;  %v289_v22 = vmul.f32 %v2705_v19, %v2705_v19 }
  0xfb   :  { %v262_v24 = vadd.f32 %v2699_v16, %v261_v21  ;;  %v304_v25 = vadd.f32 %v289_v22, %v288_v20 }
  0xfd   :  { %v305_v27 = vadd.f32 %v304_v25, %v290_v23  ;;  %v2718_v28 = vpop.f32.mrb[4].mxu0  ;;  %v263_v29 = vadd.f32 %v2703_v18, %v262_v24 }
  0xfe   :  { %v2721_v30 = vpop.f32.mrb[5].mxu0  ;;  %v294_v39 = vmul.f32 %v2718_v28, %v2718_v28 }
  0xff   :  { %v264_v31 = vadd.f32 %v263_v29, %v2721_v30  ;;  %v292_v32 = vmul.f32 %v2721_v30, %v2721_v30  ;;  %v306_v33 = vadd.f32 %v305_v27, %v291_v26  ;;  %v2726_v34 = vpop.f32.mrb[6].mxu0 }
 0x100   :  { %v2728_v35 = vpop.f32.mrb[7].mxu0  ;;  %v295_v42 = vmul.f32 %v2726_v34, %v2726_v34 }
 0x101   :  { %v307_v36 = vadd.f32 %v306_v33, %v292_v32  ;;  %v265_v37 = vadd.f32 %v264_v31, %v2728_v35  ;;  %v293_v38 = vmul.f32 %v2728_v35, %v2728_v35 }
 0x103   :  { %v266_v40 = vadd.f32 %v2718_v28, %v265_v37  ;;  %v308_v41 = vadd.f32 %v307_v36, %v293_v38 }
 0x105   :  { %v309_v43 = vadd.f32 %v308_v41, %v294_v39  ;;  %v2738_v44 = vpop.f32.mrb[8].mxu0  ;;  %v267_v45 = vadd.f32 %v2726_v34, %v266_v40 }
 0x106   :  { %v2741_v46 = vpop.f32.mrb[9].mxu0  ;;  %v298_v55 = vmul.f32 %v2738_v44, %v2738_v44 }
 0x107   :  { %v268_v47 = vadd.f32 %v267_v45, %v2741_v46  ;;  %v296_v48 = vmul.f32 %v2741_v46, %v2741_v46  ;;  %v310_v49 = vadd.f32 %v309_v43, %v295_v42  ;;  %v2746_v50 = vpop.f32.mrb[10].mxu0  ;;  %v335_v42 = vlaneseq }
 0x108   :  { %v2748_v51 = vpop.f32.mrb[11].mxu0  ;;  %v299_v58 = vmul.f32 %v2746_v50, %v2746_v50 }
 0x109   :  { %v311_v52 = vadd.f32 %v310_v49, %v296_v48  ;;  %v269_v53 = vadd.f32 %v268_v47, %v2748_v51  ;;  %v297_v54 = vmul.f32 %v2748_v51, %v2748_v51  ;;  %v2783_v48 = vshrl.u32 %v335_v42, 7 }
 0x10b   :  { %v270_v56 = vadd.f32 %v2738_v44, %v269_v53  ;;  %v312_v57 = vadd.f32 %v311_v52, %v297_v54  ;;  %v337_v53 = vsub.s32 0, %v2783_v48  ;;  %vm586_vm0 = vcmp.lt.s32.totalorder %v2783_v48, 7 }
 0x10c   :  { %vm553_vm2 = vcmp.lt.s32.totalorder %v2783_v48, 1 }
 0x10d   :  { %v313_v59 = vadd.f32 %v312_v57, %v298_v55  ;;  %v2758_v60 = vpop.f32.mrb[12].mxu0  ;;  %v271_v61 = vadd.f32 %v2746_v50, %v270_v56 }
 0x10e   :  { %v2761_v62 = vpop.f32.mrb[13].mxu0  ;;  %v302_v7 = vmul.f32 %v2758_v60, %v2758_v60 }
 0x10f   :  { %v272_v63 = vadd.f32 %v271_v61, %v2761_v62  ;;  %v300_v0 = vmul.f32 %v2761_v62, %v2761_v62  ;;  %v314_v1 = vadd.f32 %v313_v59, %v299_v58  ;;  %v2766_v2 = vpop.f32.mrb[14].mxu0 }
 0x110   :  { %v2768_v3 = vpop.f32.mrb[15].mxu0  ;;  %v303_v10 = vmul.f32 %v2766_v2, %v2766_v2 }
 0x111   :  { %v315_v4 = vadd.f32 %v314_v1, %v300_v0  ;;  %v273_v5 = vadd.f32 %v272_v63, %v2768_v3  ;;  %v301_v6 = vmul.f32 %v2768_v3, %v2768_v3 }
 0x113   :  { %v274_v8 = vadd.f32 %v2758_v60, %v273_v5  ;;  %v316_v9 = vadd.f32 %v315_v4, %v301_v6 }
 0x115   :  { %v317_v11 = vadd.f32 %v316_v9, %v302_v7  ;;  %v275_v12 = vadd.f32 %v2766_v2, %v274_v8 }
 0x117   :  { %v318_v13 = vadd.f32 %v317_v11, %v303_v10  ;;  %v276_v14 = vrot.slane %v275_v12, 4 }
 0x119   :  { %v277_v15 = vadd.f32 %v276_v14, %v275_v12  ;;  %v319_v20 = vrot.slane %v318_v13, 4 }
 0x11b   :  { %v278_v21 = vrot.slane %v277_v15, 2  ;;  %v320_v22 = vadd.f32 %v319_v20, %v318_v13 }
 0x11d   :  { %v279_v23 = vadd.f32 %v278_v21, %v277_v15  ;;  %v321_v24 = vrot.slane %v320_v22, 2 }
 0x11f   :  { %v280_v25 = vrot.slane %v279_v23, 1  ;;  %v322_v26 = vadd.f32 %v321_v24, %v320_v22 }
 0x121   :  { %v281_v27 = vadd.f32 %v280_v25, %v279_v23  ;;  %v323_v29 = vrot.slane %v322_v26, 1 }
 0x123   :  { %282 = vrot.lane.b32.xlu0 %v281_v27, %s2590_s0  ;;  %v324_v31 = vadd.f32 %v323_v29, %v322_v26 }
 0x127   :  { %325 = vrot.lane.b32.xlu0 %v324_v31, %s2590_s0 }
 0x195   :  { %v283_v32 = vpop.permute.xlu0 %282 }
 0x196   :  { %v284_v33 = vadd.f32 %v283_v32, %v281_v27 }
 0x198   :  { %285 = vrot.lane.b32.xlu1 %v284_v33, %s2591_s24 }
 0x199   :  { %v326_v36 = vpop.permute.xlu0 %325 }
 0x19a   :  { %v327_v37 = vadd.f32 %v326_v36, %v324_v31 }
 0x19c   :  { %328 = vrot.lane.b32.xlu1 %v327_v37, %s2591_s24 }
 0x20a   :  { %v286_v38 = vpop.permute.xlu1 %285 }
 0x20b   :  { %v287_v39 = vadd.f32 %v286_v38, %v284_v33 }
 0x20d   :  { %v331_v40 = vmul.f32 0.001953125, %v287_v39 }
 0x20e   :  { %v329_v41 = vpop.permute.xlu1 %328 }
 0x20f   :  { %v330_v43 = vadd.f32 %v329_v41, %v327_v37  ;;  %v333_v45 = vmul.f32 %v331_v40, %v331_v40  ;;  %v2786_v54 = vrot.slane %v331_v40, %v337_v53 }
 0x211   :  { %v332_v47 = vmul.f32 0.001953125, %v330_v43  ;;  %v341_v55 = vsub.f32 %v2699_v16, %v2786_v54  ;;  %v354_v56 = vsub.f32 %v2766_v2, %v2786_v54  ;;  %v339_v57 = vsub.f32 %v2701_v17, %v2786_v54 }
 0x212   :  { %v340_v58 = vsub.f32 %v2705_v19, %v2786_v54  ;;  %v344_v59 = vsub.f32 %v2728_v35, %v2786_v54  ;;  %v345_v63 = vsub.f32 %v2718_v28, %v2786_v54  ;;  %v342_v0 = vsub.f32 %v2703_v18, %v2786_v54  ;;  %v2817_v18 = vld [vmem:[%s3964_s2] ss:$0 sm:$0xff] }
 0x213   :  { %v334_v49 = vsub.f32 %v332_v47, %v333_v45  ;;  %v343_v16 = vsub.f32 %v2721_v30, %v2786_v54  ;;  %v348_v1 = vsub.f32 %v2748_v51, %v2786_v54  ;;  %v349_v19 = vsub.f32 %v2738_v44, %v2786_v54 }
 0x214   :  { %v346_v35 = vsub.f32 %v2726_v34, %v2786_v54  ;;  %v347_v28 = vsub.f32 %v2741_v46, %v2786_v54  ;;  %v352_v30 = vsub.f32 %v2768_v3, %v2786_v54  ;;  %v353_v51 = vsub.f32 %v2758_v60, %v2786_v54  ;;  %v2834_v3 = vld [vmem:[%s3965_s3] ss:$0 sm:$0xff] }
 0x215   :  { %v355_v52 = vadd.f32 1e-05, %v334_v49  ;;  %v350_v44 = vsub.f32 %v2746_v50, %v2786_v54  ;;  %v351_v34 = vsub.f32 %v2761_v62, %v2786_v54 }
 0x217   :  { %2586 = vrsqrt.f32 %v355_v52 }
 0x221   :  { %v2587_v61 = vpop.eup %2586 }
 0x222   :  { %v2806_v17 = vrot.slane %v2587_v61, %v337_v53 }
 0x224   :  { %v363_v2 = vmul.f32 %v2806_v17, %v341_v55  ;;  %v376_v46 = vmul.f32 %v2806_v17, %v354_v56  ;;  %v361_v4 = vmul.f32 %v2806_v17, %v339_v57  ;;  %v362_v5 = vmul.f32 %v2806_v17, %v340_v58 }
 0x225   :  { %v366_v60 = vmul.f32 %v2806_v17, %v344_v59  ;;  %v367_v50 = vmul.f32 %v2806_v17, %v345_v63  ;;  %v364_v6 = vmul.f32 %v2806_v17, %v342_v0  ;;  %v365_v62 = vmul.f32 %v2806_v17, %v343_v16 }
 0x226   :  { %v386_v7 = vmul.f32 %v2817_v18, %v363_v2  ;;  %v399_v8 = vmul.f32 %v2817_v18, %v376_v46  ;;  %v384_v9 = vmul.f32 %v2817_v18, %v361_v4  ;;  %v385_v10 = vmul.f32 %v2817_v18, %v362_v5 }
 0x227   :  { %v389_v11 = vmul.f32 %v2817_v18, %v366_v60  ;;  %v390_v12 = vmul.f32 %v2817_v18, %v367_v50  ;;  %v387_v13 = vmul.f32 %v2817_v18, %v364_v6  ;;  %v388_v14 = vmul.f32 %v2817_v18, %v365_v62 }
 0x228   :  { %v2849_v15 = vadd.f32 %v2834_v3, %v386_v7  ;;  %v2852_v20 = vadd.f32 %v2834_v3, %v399_v8  ;;  %v2855_v21 = vadd.f32 %v2834_v3, %v384_v9  ;;  %v2858_v22 = vadd.f32 %v2834_v3, %v385_v10 }
 0x229   :  { %v2861_v23 = vadd.f32 %v2834_v3, %v389_v11  ;;  %v2864_v24 = vadd.f32 %v2834_v3, %v390_v12  ;;  %v2867_v25 = vadd.f32 %v2834_v3, %v387_v13  ;;  %v2870_v26 = vadd.f32 %v2834_v3, %v388_v14 }
 0x22a   :  { %v425_v27 = vmax.f32 %v2849_v15, 0.0  ;;  %v438_v29 = vmax.f32 %v2852_v20, 0.0  ;;  %v423_v31 = vmax.f32 %v2855_v21, 0.0  ;;  %v424_v32 = vmax.f32 %v2858_v22, 0.0 }
 0x22b   :  { %v428_v33 = vmax.f32 %v2861_v23, 0.0  ;;  %v429_v36 = vmax.f32 %v2864_v24, 0.0  ;;  %v426_v37 = vmax.f32 %v2867_v25, 0.0  ;;  %v427_v38 = vmax.f32 %v2870_v26, 0.0 }
 0x22c   :  { %v2205_v39 = vpack.i.bf16 %v438_v29, %v425_v27  ;;  %v2200_v40 = vpack.i.bf16 %v424_v32, %v423_v31  ;;  %v370_v41 = vmul.f32 %v2806_v17, %v348_v1  ;;  %v371_v42 = vmul.f32 %v2806_v17, %v349_v19 }
 0x22d   :  { %v2215_v43 = vpack.i.bf16 %v429_v36, %v428_v33  ;;  %v2210_v45 = vpack.i.bf16 %v427_v38, %v426_v37  ;;  %v368_v47 = vmul.f32 %v2806_v17, %v346_v35  ;;  %v369_v49 = vmul.f32 %v2806_v17, %v347_v28 }
 0x22e   :  { %2206 = vrot.lane.b32.xlu1 %v2205_v39, %s2590_s0  ;;  %2201 = vrot.lane.b32.xlu0 %v2200_v40, %s2590_s0  ;;  %v393_v52 = vmul.f32 %v2817_v18, %v370_v41  ;;  %v394_v53 = vmul.f32 %v2817_v18, %v371_v42  ;;  %v374_v54 = vmul.f32 %v2806_v17, %v352_v30 }
 0x22f   :  { %v391_v55 = vmul.f32 %v2817_v18, %v368_v47  ;;  %v392_v56 = vmul.f32 %v2817_v18, %v369_v49  ;;  %v375_v57 = vmul.f32 %v2806_v17, %v353_v51  ;;  %v372_v58 = vmul.f32 %v2806_v17, %v350_v44  ;;  %v2536_v49 = vld [vmem:[%s3966_s4 + $0x80] sm:$0xff]  }
 0x230   :  { %v2906_v59 = vadd.f32 %v2834_v3, %v393_v52  ;;  %v2909_v61 = vadd.f32 %v2834_v3, %v394_v53  ;;  %v397_v63 = vmul.f32 %v2817_v18, %v374_v54  ;;  %v373_v0 = vmul.f32 %v2806_v17, %v351_v34  ;;  %2143 = vmatprep.subr.bf16.mxu0 %v2536_v49 }
 0x231   :  { %v2914_v16 = vadd.f32 %v2834_v3, %v391_v55  ;;  %v2917_v1 = vadd.f32 %v2834_v3, %v392_v56  ;;  %v398_v19 = vmul.f32 %v2817_v18, %v375_v57  ;;  %v395_v35 = vmul.f32 %v2817_v18, %v372_v58  ;;  %2144 = vmatpush3.bf16.msra.mxu0 %v2536_v49 }
 0x232   :  { %2216 = vrot.lane.b32.xlu1 %v2215_v43, %s2590_s0  ;;  %2211 = vrot.lane.b32.xlu0 %v2210_v45, %s2590_s0  ;;  %v432_v28 = vmax.f32 %v2906_v59, 0.0  ;;  %v433_v30 = vmax.f32 %v2909_v61, 0.0  ;;  %v2926_v17 = vadd.f32 %v2834_v3, %v397_v63  ;;  %v396_v51 = vmul.f32 %v2817_v18, %v373_v0 }
 0x233   :  { %v430_v44 = vmax.f32 %v2914_v16, 0.0  ;;  %v431_v34 = vmax.f32 %v2917_v1, 0.0  ;;  %v2932_v2 = vadd.f32 %v2834_v3, %v398_v19  ;;  %v2935_v46 = vadd.f32 %v2834_v3, %v395_v35 }
 0x234   :  { %v2225_v4 = vpack.i.bf16 %v433_v30, %v432_v28  ;;  %v436_v5 = vmax.f32 %v2926_v17, 0.0  ;;  %v2939_v60 = vadd.f32 %v2834_v3, %v396_v51 }
 0x235   :  { %v2220_v50 = vpack.i.bf16 %v431_v34, %v430_v44  ;;  %v437_v6 = vmax.f32 %v2932_v2, 0.0  ;;  %v434_v18 = vmax.f32 %v2935_v46, 0.0 }
 0x236   :  { %2226 = vrot.lane.b32.xlu1 %v2225_v4, %s2590_s0  ;;  %v435_v62 = vmax.f32 %v2939_v60, 0.0 }
 0x237   :  { %2221 = vrot.lane.b32.xlu0 %v2220_v50, %s2590_s0  ;;  %v2235_v7 = vpack.i.bf16 %v437_v6, %v436_v5 }
 0x238   :  { %v2230_v3 = vpack.i.bf16 %v435_v62, %v434_v18 }
 0x23a   :  { %2236 = vrot.lane.b32.xlu1 %v2235_v7, %s2590_s0 }
 0x23b   :  { %2231 = vrot.lane.b32.xlu0 %v2230_v3, %s2590_s0 }
 0x2a0   :  { %v2207_v8 = vpop.permute.xlu1 %2206  ;;  %v2202_v9 = vpop.permute.xlu0 %2201 }
 0x2a1   :  { %v2209_v10 = vunpack.i.h.bf16 %v2207_v8  ;;  %v2208_v11 = vunpack.i.l.bf16 %v2207_v8  ;;  %v2204_v12 = vunpack.i.h.bf16 %v2202_v9  ;;  %v2203_v13 = vunpack.i.l.bf16 %v2202_v9 }
 0x2a3   :  { %v2954_v14 = vmax.f32 %v438_v29, %v2209_v10  ;;  %v2958_v20 = vmax.f32 %v425_v27, %v2208_v11  ;;  %v2960_v22 = vmax.f32 %v424_v32, %v2204_v12  ;;  %v2964_v39 = vmax.f32 %v423_v31, %v2203_v13  ;;  %v2546_v11 = vld [vmem:[%s3966_s4 + $0x40] sm:$0xff]  }
 0x2a4   :  { %v2217_v40 = vpop.permute.xlu1 %2216  ;;  %v2212_v41 = vpop.permute.xlu0 %2211  ;;  %2028 = vmatprep.subr.bf16.mxu1 %v2546_v11 }
 0x2a5   :  { %v2219_v42 = vunpack.i.h.bf16 %v2217_v40  ;;  %v2218_v43 = vunpack.i.l.bf16 %v2217_v40  ;;  %v2214_v45 = vunpack.i.h.bf16 %v2212_v41  ;;  %v2213_v47 = vunpack.i.l.bf16 %v2212_v41 }
 0x2a6   :  { %v2245_v29 = vpack.i.bf16 %v2954_v14, %v2958_v20  ;;  %v2240_v15 = vpack.i.bf16 %v2960_v22, %v2964_v39 }
 0x2a7   :  { %v2972_v27 = vmax.f32 %v429_v36, %v2219_v42  ;;  %v2976_v21 = vmax.f32 %v428_v33, %v2218_v43  ;;  %v2980_v31 = vmax.f32 %v427_v38, %v2214_v45  ;;  %v2984_v32 = vmax.f32 %v426_v37, %v2213_v47  ;;  %v2537_v37 = vld [vmem:[%s3966_s4 + $0x88] sm:$0xff]  }
 0x2a8   :  { %2246 = vrot.lane.b32.xlu1 %v2245_v29, %s2591_s24  ;;  %2241 = vrot.lane.b32.xlu0 %v2240_v15, %s2591_s24  ;;  %v2227_v24 = vpop.permute.xlu1 %2226 }
 0x2a9   :  { %v2229_v23 = vunpack.i.h.bf16 %v2227_v24  ;;  %v2228_v33 = vunpack.i.l.bf16 %v2227_v24  ;;  %v2222_v36 = vpop.permute.xlu0 %2221  ;;  %v2255_v26 = vpack.i.bf16 %v2972_v27, %v2976_v21  ;;  %v2250_v25 = vpack.i.bf16 %v2980_v31, %v2984_v32  ;;  %2145 = vmatprep.subr.bf16.mxu0 %v2537_v37 }
 0x2aa   :  { %v2224_v38 = vunpack.i.h.bf16 %v2222_v36  ;;  %v2223_v52 = vunpack.i.l.bf16 %v2222_v36  ;;  %2146 = vmatpush3.bf16.msra.mxu0 %v2537_v37 }
 0x2ab   :  { %v2998_v53 = vmax.f32 %v433_v30, %v2229_v23  ;;  %v3000_v54 = vmax.f32 %v432_v28, %v2228_v33 }
 0x2ac   :  { %v3002_v55 = vmax.f32 %v431_v34, %v2224_v38  ;;  %v3004_v56 = vmax.f32 %v430_v44, %v2223_v52  ;;  %2256 = vrot.lane.b32.xlu1 %v2255_v26, %s2591_s24  ;;  %2251 = vrot.lane.b32.xlu0 %v2250_v25, %s2591_s24  ;;  %v2237_v57 = vpop.permute.xlu1 %2236 }
 0x2ad   :  { %v2239_v58 = vunpack.i.h.bf16 %v2237_v57  ;;  %v2238_v59 = vunpack.i.l.bf16 %v2237_v57  ;;  %v2232_v61 = vpop.permute.xlu0 %2231  ;;  %v2265_v63 = vpack.i.bf16 %v2998_v53, %v3000_v54 }
 0x2ae   :  { %v2234_v0 = vunpack.i.h.bf16 %v2232_v61  ;;  %v2233_v16 = vunpack.i.l.bf16 %v2232_v61  ;;  %v2260_v1 = vpack.i.bf16 %v3002_v55, %v3004_v56 }
 0x2af   :  { %v3014_v19 = vmax.f32 %v437_v6, %v2239_v58  ;;  %v3018_v35 = vmax.f32 %v436_v5, %v2238_v59  ;;  %v2549_v59 = vld [vmem:[%s3966_s4 + $0x8] sm:$0xff]  }
 0x2b0   :  { %v3020_v28 = vmax.f32 %v435_v62, %v2234_v0  ;;  %v3024_v30 = vmax.f32 %v434_v18, %v2233_v16  ;;  %2266 = vrot.lane.b32.xlu1 %v2265_v63, %s2591_s24  ;;  %2261 = vrot.lane.b32.xlu0 %v2260_v1, %s2591_s24 }
 0x2b1   :  { %v2275_v51 = vpack.i.bf16 %v3014_v19, %v3018_v35 }
 0x2b2   :  { %v2270_v44 = vpack.i.bf16 %v3020_v28, %v3024_v30 }
 0x2b4   :  { %2276 = vrot.lane.b32.xlu1 %v2275_v51, %s2591_s24  ;;  %2271 = vrot.lane.b32.xlu0 %v2270_v44, %s2591_s24 }
 0x31a   :  { %v2247_v17 = vpop.permute.xlu1 %2246  ;;  %v2242_v34 = vpop.permute.xlu0 %2241 }
 0x31b   :  { %v2249_v2 = vunpack.i.h.bf16 %v2247_v17  ;;  %v2248_v46 = vunpack.i.l.bf16 %v2247_v17  ;;  %v2244_v4 = vunpack.i.h.bf16 %v2242_v34  ;;  %v2243_v5 = vunpack.i.l.bf16 %v2242_v34 }
 0x31d   :  { %v3035_v60 = vmax.f32 %v2954_v14, %v2249_v2  ;;  %v3038_v50 = vmax.f32 %v2958_v20, %v2248_v46  ;;  %v3041_v6 = vmax.f32 %v2960_v22, %v2244_v4  ;;  %v3044_v18 = vmax.f32 %v2964_v39, %v2243_v5  ;;  %v2540_v2 = vld [vmem:[%s3967_s5 + $0x38] ss:$12 sps:$4 sm:$0xff]  }
 0x31e   :  { %v2257_v62 = vpop.permute.xlu1 %2256  ;;  %v2252_v7 = vpop.permute.xlu0 %2251 }
 0x31f   :  { %v2259_v3 = vunpack.i.h.bf16 %v2257_v62  ;;  %v2258_v8 = vunpack.i.l.bf16 %v2257_v62  ;;  %v2254_v9 = vunpack.i.h.bf16 %v2252_v7  ;;  %v2253_v10 = vunpack.i.l.bf16 %v2252_v7 }
 0x320   :  { %v2285_v12 = vpack.i.bf16 %v3038_v50, %v3041_v6  ;;  %v3053_v13 = vpack.i.bf16 %v3044_v18, %v3035_v60  ;;  %v572_v49 = vrot.slane %v3038_v50, 1 }
 0x321   :  { %v3056_v14 = vmax.f32 %v2976_v21, %v2258_v8  ;;  %v3059_v20 = vmax.f32 %v2980_v31, %v2254_v9  ;;  %v3062_v22 = vmax.f32 %v2984_v32, %v2253_v10  ;;  %v3065_v39 = vmax.f32 %v2972_v27, %v2259_v3  ;;  %v2547_v21 = vld [vmem:[%s3966_s4] sm:$0xff]   ;;  %v2548_v31 = vld [vmem:[%s3966_s4 + $0x48] sm:$0xff]   ;;  %v2551_v8 = vld [vmem:[%s3966_s4 + $0x10] sm:$0xff]  }
 0x322   :  { %2286 = vrot.lane.b32.xlu0 %v2285_v12, %s2592_s13  ;;  %2281 = vrot.lane.b32.xlu1 %v3053_v13, %s2591_s24  ;;  %v2267_v40 = vpop.permute.xlu1 %2266  ;;  %v2262_v41 = vpop.permute.xlu0 %2261  ;;  %v571_v32 = vrot.slane %v3041_v6, 1 }
 0x323   :  { %v575_v42 = vrot.slane %v3056_v14, 1  ;;  %v574_v43 = vrot.slane %v3059_v20, 1  ;;  %v2268_v45 = vunpack.i.l.bf16 %v2267_v40  ;;  %v2269_v47 = vunpack.i.h.bf16 %v2267_v40  ;;  %2029 = vmatpush3.bf16.msra.mxu1 %v2547_v21  ;;  %v2554_v21 = vld [vmem:[%s3966_s4 + $0x60] sm:$0xff]  }
 0x324   :  { %v2264_v29 = vunpack.i.h.bf16 %v2262_v41  ;;  %v2263_v15 = vunpack.i.l.bf16 %v2262_v41  ;;  %v2295_v27 = vpack.i.bf16 %v3059_v20, %v3062_v22  ;;  %v2305_v36 = vpack.i.bf16 %v3065_v39, %v3056_v14  ;;  %2030 = vmatprep.subr.bf16.mxu1 %v2548_v31 }
 0x325   :  { %v573_v26 = vrot.slane %v3062_v22, 1  ;;  %v3093_v25 = vsel %vm586_vm0, %v574_v43, %v575_v42  ;;  %v3096_v37 = vmax.f32 %v3000_v54, %v2268_v45  ;;  %v3105_v57 = vmax.f32 %v2998_v53, %v2269_v47  ;;  %v2550_v53 = vld [vmem:[%s3966_s4 + $0x50] sm:$0xff]  }
 0x326   :  { %v3084_v24 = vmax.f32 %v3004_v56, %v2263_v15  ;;  %2296 = vrot.lane.b32.xlu0 %v2295_v27, %s2592_s13  ;;  %2291 = vrot.lane.b32.xlu1 %v2285_v12, %s2591_s24  ;;  %v2277_v23 = vpop.permute.xlu1 %2276  ;;  %v2272_v33 = vpop.permute.xlu0 %2271  ;;  %v3099_v38 = vmax.f32 %v3002_v55, %v2264_v29  ;;  %v2538_v56 = vld [vmem:[%s3967_s5 + $0x8] ss:$12 sps:$4 sm:$0xff]   ;;  %v2539_v55 = vld [vmem:[%s3967_s5 + $0x20] ss:$12 sps:$4 sm:$0xff]   ;;  %v3131_v16 = vsel %vm586_vm0, %v571_v32, %v572_v49  ;;  %v576_v44 = vrot.slane %v3065_v39, 1 }
 0x327   :  { %v2273_v52 = vunpack.i.l.bf16 %v2272_v33  ;;  %v3109_v58 = vsel %vm586_vm0, %v573_v26, %v574_v43  ;;  %v3113_v54 = vsel %vm586_vm0, %v572_v49, %v573_v26  ;;  %v2278_v61 = vunpack.i.l.bf16 %v2277_v23  ;;  %2031 = vmatpush3.bf16.msra.mxu1 %v2549_v59  ;;  %v2552_v12 = vld [vmem:[%s3966_s4 + $0x58] sm:$0xff]   ;;  %v2542_v49 = vld [vmem:[%s3967_s5 + $0x68] ss:$12 sps:$4 sm:$0xff]   ;;  %v2555_v59 = vld [vmem:[%s3966_s4 + $0x20] sm:$0xff]  }
 0x328   :  { %v2274_v63 = vunpack.i.h.bf16 %v2272_v33  ;;  %v1040_v1 = vpack.c.bf16 %v3113_v54, %v3131_v16  ;;  %v1043_v51 = vpack.c.bf16 %v3093_v25, %v3109_v58  ;;  %v2279_v17 = vunpack.i.h.bf16 %v2277_v23  ;;  %2032 = vmatprep.subr.bf16.mxu1 %v2550_v53  ;;  %v2553_v29 = vld [vmem:[%s3966_s4 + $0x18] sm:$0xff]  }
 0x329   :  { %v3125_v0 = vmax.f32 %v3024_v30, %v2273_v52  ;;  %v577_v30 = vrot.slane %v3084_v24, 1  ;;  %v2315_v34 = vpack.i.bf16 %v3099_v38, %v3084_v24  ;;  %v578_v46 = vrot.slane %v3099_v38, 1  ;;  %v2541_v15 = vld [vmem:[%s3967_s5 + $0x50] ss:$12 sps:$4 sm:$0xff]  }
 0x32a   :  { %2306 = vrot.lane.b32.xlu0 %v2305_v36, %s2592_s13  ;;  %2301 = vrot.lane.b32.xlu1 %v2295_v27, %s2591_s24  ;;  %v579_v4 = vrot.slane %v3096_v37, 1  ;;  %v1224_v5 = vmul.bf16 %v2538_v56, %v1040_v1  ;;  %v1227_v62 = vmul.bf16 %v2539_v55, %v1043_v51  ;;  %v3154_v3 = vsel %vm586_vm0, %v575_v42, %v576_v44 }
 0x32b   :  { %v3150_v7 = vsel %vm586_vm0, %v576_v44, %v577_v30  ;;  %v3160_v9 = vmax.f32 %v3018_v35, %v2278_v61  ;;  %v580_v11 = vrot.slane %v3105_v57, 1  ;;  %v3169_v40 = vmax.f32 %v3020_v28, %v2274_v63  ;;  %2033 = vmatpush3.bf16.msra.mxu1 %v2551_v8  ;;  %v2556_v44 = vld [vmem:[%s3966_s4 + $0x68] sm:$0xff]  }
 0x32c   :  { %v1046_v10 = vpack.c.bf16 %v3150_v7, %v3154_v3  ;;  %2147 = vmatprep.mubr.msk.bf16.mxu0 %vm939_vm1, %v1224_v5  ;;  %v3175_v35 = vsel %vm586_vm0, %v578_v46, %v579_v4  ;;  %v3179_v41 = vsel %vm586_vm0, %v577_v30, %v578_v46  ;;  %v581_v42 = vrot.slane %v3125_v0, 1  ;;  %2034 = vmatprep.subr.bf16.mxu1 %v2552_v12 }
 0x32d   :  { %v3183_v43 = vmax.f32 %v3014_v19, %v2279_v17  ;;  %2148 = vmatmul.mubr.msk.bf16.vlgmr.msra.gmra.mrb[16].mxu0 %vm939_vm1, %v1227_v62  ;;  %v2325_v45 = vpack.i.bf16 %v3105_v57, %v3096_v37  ;;  %v1049_v19 = vpack.c.bf16 %v3175_v35, %v3179_v41  ;;  %v3204_v27 = vsel %vm586_vm0, %v579_v4, %v580_v11  ;;  %v2557_v62 = vld [vmem:[%s3966_s4 + $0x28] sm:$0xff]  }
 0x32e   :  { %2316 = vrot.lane.b32.xlu0 %v2315_v34, %s2592_s13  ;;  %2311 = vrot.lane.b32.xlu1 %v2305_v36, %s2591_s24  ;;  %v1230_v28 = vmul.bf16 %v2540_v2, %v1046_v10  ;;  %v3191_v47 = vsel %vm586_vm0, %v580_v11, %v581_v42  ;;  %v582_v23 = vrot.slane %v3169_v40, 1  ;;  %v583_v33 = vrot.slane %v3160_v9, 1  ;;  %v2543_v2 = vld [vmem:[%s3967_s5 + $0x80] ss:$12 sps:$4 sm:$0xff]  }
 0x32f   :  { %3974 = vst [vmem:[#allocation2_spill] sm:$0xff] %v3183_v43  ;;  %v1052_v31 = vpack.c.bf16 %v3191_v47, %v3204_v27  ;;  %v584_v36 = vrot.slane %v3183_v43, 1  ;;  %v2335_v26 = vpack.i.bf16 %v3169_v40, %v3125_v0  ;;  %2035 = vmatpush3.bf16.msra.mxu1 %v2553_v29  ;;  %v1233_v52 = vmul.bf16 %v2541_v15, %v1049_v19 }
 0x330   :  { %2151 = vmatprep.mubr.msk.bf16.mxu0 %vm939_vm1, %v1230_v28  ;;  %v585_v56 = vrot.slane %v3035_v60, 1  ;;  %v570_v55 = vrot.slane %v3044_v18, 1  ;;  %2036 = vmatprep.subr.bf16.mxu1 %v2554_v21  ;;  %v3229_v61 = vsel %vm586_vm0, %v582_v23, %v583_v33  ;;  %v3233_v63 = vsel %vm586_vm0, %v581_v42, %v582_v23  ;;  %v2558_v28 = vld [vmem:[%s3966_s4 + $0x70] sm:$0xff]  }
 0x331   :  { %v1236_v53 = vmul.bf16 %v2542_v49, %v1052_v31  ;;  %v3243_v51 = vsel %vm586_vm0, %v583_v33, %v584_v36  ;;  %v2345_v30 = vpack.i.bf16 %v3183_v43, %v3160_v9  ;;  %v535_v17 = vrot.slane %v3044_v18, 7  ;;  %v2559_v21 = vld [vmem:[%s3966_s4 + $0x30] sm:$0xff]  }
 0x332   :  { %2326 = vrot.lane.b32.xlu0 %v2325_v45, %s2592_s13  ;;  %2321 = vrot.lane.b32.xlu1 %v2315_v34, %s2591_s24  ;;  %v3239_v1 = vsel %vm586_vm0, %v584_v36, %v585_v56  ;;  %v1055_v34 = vpack.c.bf16 %v3229_v61, %v3233_v63  ;;  %v601_v46 = vsel %vm586_vm0, %v570_v55, %v571_v32  ;;  %v536_v4 = vrot.slane %v3041_v6, 7  ;;  %v2544_v32 = vld [vmem:[%s3967_s5 + $0x98] ss:$12 sps:$4 sm:$0xff]   ;;  %v2545_v23 = vld [vmem:[%s3967_s5 + $0xb0] ss:$12 sps:$4 sm:$0xff]  }
 0x333   :  { %v537_v5 = vrot.slane %v3038_v50, 7  ;;  %2037 = vmatpush3.bf16.msra.mxu1 %v2555_v59  ;;  %v1058_v8 = vpack.c.bf16 %v3239_v1, %v3243_v51  ;;  %v2355_v10 = vpack.i.bf16 %v3131_v16, %v601_v46  ;;  %v3289_v29 = vsel %vm586_vm0, %v585_v56, %v570_v55  ;;  %v2561_v55 = vld [vmem:[%s3966_s4 + $0x38] sm:$0xff]  }
 0x334   :  { %2038 = vmatprep.subr.bf16.mxu1 %v2556_v44  ;;  %v1239_v11 = vmul.bf16 %v2543_v2, %v1055_v34  ;;  %v3281_v42 = vsel %vm553_vm2, %v535_v17, %v536_v4  ;;  %v550_v19 = vrot.slane %v3035_v60, 7  ;;  %v2365_v31 = vpack.i.bf16 %v601_v46, %v3289_v29 }
 0x335   :  { %2152 = vmatmul.mubr.msk.bf16.gmra.mrb[20].mxu0 %vm939_vm1, %v1233_v52  ;;  %v3277_v12 = vsel %vm553_vm2, %v536_v4, %v537_v5  ;;  %v1061_v49 = vpack.c.bf16 %v601_v46, %v3289_v29  ;;  %v538_v33 = vrot.slane %v3062_v22, 7  ;;  %v539_v36 = vrot.slane %v3059_v20, 7 }
 0x336   :  { %2336 = vrot.lane.b32.xlu0 %v2335_v26, %s2592_s13  ;;  %2331 = vrot.lane.b32.xlu1 %v2325_v45, %s2591_s24  ;;  %v1242_v45 = vmul.bf16 %v2544_v32, %v1058_v8  ;;  %v2360_v15 = vpack.i.bf16 %v3277_v12, %v3281_v42  ;;  %v3315_v52 = vsel %vm553_vm2, %v550_v19, %v535_v17  ;;  %v540_v2 = vrot.slane %v3056_v14, 7 }
 0x337   :  { %2155 = vmatprep.mubr.msk.bf16.mxu0 %vm939_vm1, %v1236_v53  ;;  %2039 = vmatpush3.bf16.msra.mxu1 %v2557_v62  ;;  %v2375_v56 = vpack.i.bf16 %v3109_v58, %v3113_v54  ;;  %v1245_v59 = vmul.bf16 %v2545_v23, %v1061_v49  ;;  %v2370_v53 = vpack.i.bf16 %v3281_v42, %v3315_v52  ;;  %v541_v46 = vrot.slane %v3065_v39, 7 }
 0x338   :  { %2040 = vmatprep.subr.bf16.mxu1 %v2558_v28  ;;  %v3327_v44 = vsel %vm553_vm2, %v538_v33, %v539_v36  ;;  %v2385_v34 = vpack.i.bf16 %v3113_v54, %v3131_v16  ;;  %v2395_v4 = vpack.i.bf16 %v3154_v3, %v3093_v25  ;;  %v3354_v54 = vsel %vm553_vm2, %v539_v36, %v540_v2 }
 0x339   :  { %v3350_v62 = vsel %vm553_vm2, %v540_v2, %v541_v46  ;;  %v2405_v8 = vpack.i.bf16 %v3093_v25, %v3109_v58  ;;  %v542_v32 = vrot.slane %v3084_v24, 7  ;;  %v2410_v28 = vpack.i.bf16 %v3354_v54, %v3327_v44 }
 0x33a   :  { %2346 = vrot.lane.b32.xlu0 %v2345_v30, %s2592_s13  ;;  %2341 = vrot.lane.b32.xlu1 %v2335_v26, %s2591_s24  ;;  %v2560_v26 = vld [vmem:[%s3966_s4 + $0x78] sm:$0xff]   ;;  %v2400_v16 = vpack.i.bf16 %v3350_v62, %v3354_v54  ;;  %v2435_v49 = vpack.i.bf16 %v3204_v27, %v3175_v35  ;;  %v2445_v36 = vpack.i.bf16 %v3175_v35, %v3179_v41  ;;  %v549_v2 = vrot.slane %v3183_v43, 7 }
 0x33b   :  { %2041 = vmatpush3.bf16.msra.mxu1 %v2559_v21  ;;  %v3376_v25 = vsel %vm553_vm2, %v541_v46, %v542_v32  ;;  %v544_v21 = vrot.slane %v3096_v37, 7  ;;  %v2475_v46 = vpack.i.bf16 %v3243_v51, %v3229_v61 }
 0x33c   :  { %2042 = vmatprep.subr.bf16.mxu1 %v2560_v26  ;;  %v2430_v23 = vpack.i.bf16 %v3376_v25, %v3350_v62  ;;  %v546_v26 = vrot.slane %v3125_v0, 7 }
 0x33d   :  { %2156 = vmatmul.mubr.msk.bf16.gmra.mrb[24].mxu0 %vm939_vm1, %v1239_v11  ;;  %v2415_v11 = vpack.i.bf16 %v3179_v41, %v3150_v7 }
 0x33e   :  { %2356 = vrot.lane.b32.xlu0 %v2355_v10, %s2591_s24  ;;  %2351 = vrot.lane.b32.xlu1 %v2345_v30, %s2591_s24  ;;  %v3331_v30 = vsel %vm553_vm2, %v537_v5, %v538_v33  ;;  %v543_v10 = vrot.slane %v3099_v38, 7 }
 0x33f   :  { %2159 = vmatprep.mubr.msk.bf16.mxu0 %vm939_vm1, %v1242_v45  ;;  %v2380_v17 = vpack.i.bf16 %v3327_v44, %v3331_v30  ;;  %2043 = vmatpush3.bf16.msra.mxu1 %v2561_v55  ;;  %v2390_v5 = vpack.i.bf16 %v3331_v30, %v3277_v12  ;;  %v2455_v55 = vpack.i.bf16 %v3233_v63, %v3191_v47 }
 0x340   :  { %v3372_v45 = vsel %vm553_vm2, %v542_v32, %v543_v10 }
 0x341   :  { %v2420_v58 = vpack.i.bf16 %v3372_v45, %v3376_v25 }
 0x342   :  { %2361 = vrot.lane.b32.xlu0 %v2360_v15, %s2590_s0  ;;  %2366 = vrot.lane.b32.xlu1 %v2365_v31, %s2590_s0  ;;  %v2425_v15 = vpack.i.bf16 %v3150_v7, %v3154_v3  ;;  %v545_v31 = vrot.slane %v3105_v57, 7  ;;  %v3398_v7 = vsel %vm553_vm2, %v543_v10, %v544_v21  ;;  %v554_v10 = vsel %vm553_vm2, %v549_v2, %v550_v19 }
 0x344   :  { %v3394_v33 = vsel %vm553_vm2, %v544_v21, %v545_v31  ;;  %v3420_v35 = vsel %vm553_vm2, %v545_v31, %v546_v26 }
 0x345   :  { %2160 = vmatmul.mubr.msk.bf16.gmra.mrb[28].mxu0 %vm939_vm1, %v1245_v59  ;;  %v2440_v3 = vpack.i.bf16 %v3394_v33, %v3398_v7  ;;  %v2450_v59 = vpack.i.bf16 %v3398_v7, %v3372_v45 }
 0x346   :  { %2376 = vrot.lane.b32.xlu0 %v2375_v56, %s2591_s24  ;;  %2371 = vrot.lane.b32.xlu1 %v2370_v53, %s2592_s13  ;;  %v547_v56 = vrot.slane %v3169_v40, 7 }
 0x348   :  { %v3416_v53 = vsel %vm553_vm2, %v546_v26, %v547_v56 }
 0x349   :  { %v2460_v41 = vpack.i.bf16 %v3416_v53, %v3420_v35 }
 0x34a   :  { %2381 = vrot.lane.b32.xlu0 %v2380_v17, %s2590_s0  ;;  %2386 = vrot.lane.b32.xlu1 %v2385_v34, %s2590_s0  ;;  %v2465_v17 = vpack.i.bf16 %v3191_v47, %v3204_v27  ;;  %v548_v34 = vrot.slane %v3160_v9, 7 }
 0x34c   :  { %v3442_v47 = vsel %vm553_vm2, %v547_v56, %v548_v34 }
 0x34d   :  { %v2490_v32 = vpack.i.bf16 %v3442_v47, %v3416_v53 }
 0x34e   :  { %2396 = vrot.lane.b32.xlu0 %v2395_v4, %s2591_s24  ;;  %2391 = vrot.lane.b32.xlu1 %v2390_v5, %s2592_s13  ;;  %v2470_v4 = vpack.i.bf16 %v3420_v35, %v3394_v33  ;;  %v3438_v5 = vsel %vm553_vm2, %v548_v34, %v549_v2 }
 0x34f   :  { %v2480_v27 = vpack.i.bf16 %v3438_v5, %v3442_v47 }
 0x352   :  { %2401 = vrot.lane.b32.xlu0 %v2400_v16, %s2590_s0  ;;  %2406 = vrot.lane.b32.xlu1 %v2405_v8, %s2590_s0  ;;  %v2485_v16 = vpack.i.bf16 %v3229_v61, %v3233_v63  ;;  %v2495_v8 = vpack.i.bf16 %v3289_v29, %v3239_v1  ;;  %v2500_v61 = vpack.i.bf16 %v3315_v52, %v554_v10 }
 0x353   :  { %v2505_v63 = vpack.i.bf16 %v3239_v1, %v3243_v51  ;;  %v2515_v29 = vpack.i.bf16 %v554_v10, %v3438_v5 }
 0x356   :  { %2416 = vrot.lane.b32.xlu0 %v2415_v11, %s2591_s24  ;;  %2411 = vrot.lane.b32.xlu1 %v2410_v28, %s2592_s13 }
 0x35a   :  { %2421 = vrot.lane.b32.xlu0 %v2420_v58, %s2590_s0  ;;  %2426 = vrot.lane.b32.xlu1 %v2425_v15, %s2590_s0 }
 0x35e   :  { %2436 = vrot.lane.b32.xlu0 %v2435_v49, %s2591_s24  ;;  %2431 = vrot.lane.b32.xlu1 %v2430_v23, %s2592_s13 }
 0x362   :  { %2441 = vrot.lane.b32.xlu0 %v2440_v3, %s2590_s0  ;;  %2446 = vrot.lane.b32.xlu1 %v2445_v36, %s2590_s0 }
 0x366   :  { %2456 = vrot.lane.b32.xlu0 %v2455_v55, %s2591_s24  ;;  %2451 = vrot.lane.b32.xlu1 %v2450_v59, %s2592_s13 }
 0x36a   :  { %2461 = vrot.lane.b32.xlu0 %v2460_v41, %s2590_s0  ;;  %2466 = vrot.lane.b32.xlu1 %v2465_v17, %s2590_s0 }
 0x36e   :  { %2476 = vrot.lane.b32.xlu0 %v2475_v46, %s2591_s24  ;;  %2471 = vrot.lane.b32.xlu1 %v2470_v4, %s2592_s13 }
 0x372   :  { %2481 = vrot.lane.b32.xlu0 %v2480_v27, %s2590_s0  ;;  %2486 = vrot.lane.b32.xlu1 %v2485_v16, %s2590_s0 }
 0x376   :  { %2496 = vrot.lane.b32.xlu0 %v2495_v8, %s2591_s24  ;;  %2491 = vrot.lane.b32.xlu1 %v2490_v32, %s2592_s13 }
 0x37a   :  { %2501 = vrot.lane.b32.xlu0 %v2500_v61, %s2590_s0  ;;  %2506 = vrot.lane.b32.xlu1 %v2505_v63, %s2590_s0 }
 0x37e   :  { %2511 = vrot.lane.b32.xlu0 %v3053_v13, %s2592_s13  ;;  %2516 = vrot.lane.b32.xlu1 %v2515_v29, %s2592_s13 }
 0x394   :  { %v2287_v48 = vpop.permute.xlu0 %2286  ;;  %v2282_v19 = vpop.permute.xlu1 %2281 }
 0x395   :  { %v2284_v41 = vunpack.i.h.bf16 %v2282_v19  ;;  %v2283_v17 = vunpack.i.l.bf16 %v2282_v19  ;;  %v2289_v4 = vunpack.i.h.bf16 %v2287_v48  ;;  %v2288_v27 = vunpack.i.l.bf16 %v2287_v48  ;;  %v2564_v19 = vld [vmem:[%s3967_s5 + $0x4] ss:$12 sps:$4 sm:$0xff]  }
 0x398   :  { %v3471_v11 = vpop.permute.xlu0 %2296  ;;  %v3473_v28 = vpop.permute.xlu1 %2291 }
 0x39c   :  { %v3475_v58 = vpop.permute.xlu0 %2306  ;;  %v3477_v1 = vpop.permute.xlu1 %2301 }
 0x3a0   :  { %v3479_v51 = vpop.permute.xlu0 %2316  ;;  %v3481_v15 = vpop.permute.xlu1 %2311 }
 0x3a4   :  { %v3483_v21 = vpop.permute.xlu0 %2326  ;;  %v3485_v31 = vpop.permute.xlu1 %2321 }
 0x3a8   :  { %v3487_v13 = vpop.permute.xlu0 %2336  ;;  %v3489_v49 = vpop.permute.xlu1 %2331 }
 0x3ac   :  { %v3491_v23 = vpop.permute.xlu0 %2346  ;;  %v3493_v3 = vpop.permute.xlu1 %2341 }
 0x3b0   :  { %v2357_v36 = vpop.permute.xlu0 %2356  ;;  %v3495_v26 = vpop.permute.xlu1 %2351 }
 0x3b1   :  { %v2359_v56 = vunpack.i.h.bf16 %v2357_v36  ;;  %v2358_v55 = vunpack.i.l.bf16 %v2357_v36 }
 0x3b3   :  { %v991_v16 = vsel %vm939_vm1, %v3041_v6, %v2359_v56  ;;  %v990_v8 = vsel %vm939_vm1, %v3044_v18, %v2358_v55  ;;  %v940_v6 = vsel %vm939_vm1, %v554_v10, %v2283_v17  ;;  %v941_v18 = vsel %vm939_vm1, %v3315_v52, %v2284_v41 }
 0x3b4   :  { %v2362_v59 = vpop.permute.xlu0 %2361  ;;  %v2367_v34 = vpop.permute.xlu1 %2366  ;;  %v2299_v10 = vunpack.i.h.bf16 %v3471_v11  ;;  %v2294_v17 = vunpack.i.h.bf16 %v3473_v28 }
 0x3b5   :  { %v2364_v2 = vunpack.i.h.bf16 %v2362_v59  ;;  %v2363_v46 = vunpack.i.l.bf16 %v2362_v59  ;;  %v2369_v32 = vunpack.i.h.bf16 %v2367_v34  ;;  %v2368_v61 = vunpack.i.l.bf16 %v2367_v34 }
 0x3b7   :  { %v1006_v63 = vsel %vm956_vm3, %v990_v8, %v2363_v46  ;;  %v1007_v29 = vsel %vm956_vm3, %v991_v16, %v2364_v2  ;;  %v957_v16 = vsel %vm956_vm3, %v940_v6, %v2368_v61  ;;  %v958_v43 = vsel %vm956_vm3, %v941_v18, %v2369_v32 }
 0x3b8   :  { %v2377_v36 = vpop.permute.xlu0 %2376  ;;  %v1022_v59 = vsel %vm973_vm4, %v1006_v63, %v2288_v27  ;;  %v1023_v48 = vsel %vm973_vm4, %v1007_v29, %v2289_v4  ;;  %v2372_v56 = vpop.permute.xlu1 %2371  ;;  %v2562_v27 = vld [vmem:[%s3967_s5] ss:$12 sps:$4 sm:$0xff]   ;;  %v2293_v29 = vunpack.i.l.bf16 %v3473_v28 }
 0x3b9   :  { %v1039_v55 = vpack.c.bf16 %v1023_v48, %v1022_v59  ;;  %v2374_v34 = vunpack.i.h.bf16 %v2372_v56  ;;  %v2373_v46 = vunpack.i.l.bf16 %v2372_v56  ;;  %v2379_v8 = vunpack.i.h.bf16 %v2377_v36 }
 0x3ba   :  { %v2378_v2 = vunpack.i.l.bf16 %v2377_v36  ;;  %v2298_v48 = vunpack.i.l.bf16 %v3471_v11 }
 0x3bb   :  { %v1223_v4 = vmul.bf16 %v2564_v19, %v1039_v55  ;;  %v975_v52 = vsel %vm973_vm4, %v958_v43, %v2374_v34  ;;  %v974_v41 = vsel %vm973_vm4, %v957_v16, %v2373_v46  ;;  %v993_v19 = vsel %vm939_vm1, %v3062_v22, %v2379_v8  ;;  %v2565_v34 = vld [vmem:[%s3967_s5 + $0x1c] ss:$12 sps:$4 sm:$0xff]  }
 0x3bc   :  { %v2382_v63 = vpop.permute.xlu0 %2381  ;;  %v2387_v36 = vpop.permute.xlu1 %2386  ;;  %v1038_v32 = vpack.c.bf16 %v975_v52, %v974_v41  ;;  %v992_v6 = vsel %vm939_vm1, %v3038_v50, %v2378_v2  ;;  %v943_v22 = vsel %vm939_vm1, %v3277_v12, %v2294_v17  ;;  %v942_v50 = vsel %vm939_vm1, %v3281_v42, %v2293_v29 }
 0x3bd   :  { %v2384_v61 = vunpack.i.h.bf16 %v2382_v63  ;;  %v2383_v59 = vunpack.i.l.bf16 %v2382_v63  ;;  %1446 = vmatprep.mubr.bf16.mxu1 %v1223_v4  ;;  %v2389_v18 = vunpack.i.h.bf16 %v2387_v36  ;;  %v2388_v43 = vunpack.i.l.bf16 %v2387_v36 }
 0x3be   :  { %v1222_v28 = vmul.bf16 %v2562_v27, %v1038_v32  ;;  %v2309_v12 = vunpack.i.h.bf16 %v3475_v58  ;;  %v2304_v42 = vunpack.i.h.bf16 %v3477_v1  ;;  %v2303_v32 = vunpack.i.l.bf16 %v3477_v1 }
 0x3bf   :  { %v1008_v56 = vsel %vm956_vm3, %v992_v6, %v2383_v59  ;;  %v1009_v55 = vsel %vm956_vm3, %v993_v19, %v2384_v61  ;;  %v960_v63 = vsel %vm956_vm3, %v943_v22, %v2389_v18  ;;  %v959_v36 = vsel %vm956_vm3, %v942_v50, %v2388_v43 }
 0x3c0   :  { %v2397_v46 = vpop.permute.xlu0 %2396  ;;  %v1024_v11 = vsel %vm973_vm4, %v1008_v56, %v2298_v48  ;;  %v1025_v16 = vsel %vm973_vm4, %v1009_v55, %v2299_v10  ;;  %v2392_v8 = vpop.permute.xlu1 %2391  ;;  %1447 = vmatmul.mubr.bf16.vlgmr.msra.gmra.mrb[0].mxu1 %v1222_v28  ;;  %v2567_v10 = vld [vmem:[%s3967_s5 + $0x18] ss:$12 sps:$4 sm:$0xff]   ;;  %v2308_v43 = vunpack.i.l.bf16 %v3475_v58 }
 0x3c1   :  { %v1042_v2 = vpack.c.bf16 %v1025_v16, %v1024_v11  ;;  %v2394_v4 = vunpack.i.h.bf16 %v2392_v8  ;;  %v2393_v27 = vunpack.i.l.bf16 %v2392_v8  ;;  %v2399_v52 = vunpack.i.h.bf16 %v2397_v46  ;;  %v2568_v16 = vld [vmem:[%s3967_s5 + $0x34] ss:$12 sps:$4 sm:$0xff]  }
 0x3c2   :  { %v2398_v41 = vunpack.i.l.bf16 %v2397_v46 }
 0x3c3   :  { %v1226_v61 = vmul.bf16 %v2565_v34, %v1042_v2  ;;  %v976_v17 = vsel %vm973_vm4, %v959_v36, %v2393_v27  ;;  %v977_v29 = vsel %vm973_vm4, %v960_v63, %v2394_v4  ;;  %v995_v56 = vsel %vm939_vm1, %v3056_v14, %v2399_v52 }
 0x3c4   :  { %v2402_v59 = vpop.permute.xlu0 %2401  ;;  %v2407_v48 = vpop.permute.xlu1 %2406  ;;  %v1041_v18 = vpack.c.bf16 %v977_v29, %v976_v17  ;;  %v994_v55 = vsel %vm939_vm1, %v3059_v20, %v2398_v41  ;;  %v945_v14 = vsel %vm939_vm1, %v3327_v44, %v2304_v42  ;;  %v944_v20 = vsel %vm939_vm1, %v3331_v30, %v2303_v32 }
 0x3c5   :  { %v2404_v19 = vunpack.i.h.bf16 %v2402_v59  ;;  %v2403_v6 = vunpack.i.l.bf16 %v2402_v59  ;;  %1454 = vmatprep.mubr.bf16.mxu1 %v1226_v61  ;;  %v2409_v28 = vunpack.i.h.bf16 %v2407_v48  ;;  %v2408_v34 = vunpack.i.l.bf16 %v2407_v48 }
 0x3c6   :  { %v1225_v1 = vmul.bf16 %v2567_v10, %v1041_v18  ;;  %v2570_v10 = vld [vmem:[%s3967_s5 + $0x30] ss:$12 sps:$4 sm:$0xff]   ;;  %v2319_v44 = vunpack.i.h.bf16 %v3479_v51  ;;  %v2314_v30 = vunpack.i.h.bf16 %v3481_v15  ;;  %v2313_v29 = vunpack.i.l.bf16 %v3481_v15 }
 0x3c7   :  { %v1010_v46 = vsel %vm956_vm3, %v994_v55, %v2403_v6  ;;  %v1011_v11 = vsel %vm956_vm3, %v995_v56, %v2404_v19  ;;  %v962_v63 = vsel %vm956_vm3, %v945_v14, %v2409_v28  ;;  %v961_v36 = vsel %vm956_vm3, %v944_v20, %v2408_v34 }
 0x3c8   :  { %v2417_v22 = vpop.permute.xlu0 %2416  ;;  %v1026_v58 = vsel %vm973_vm4, %v1010_v46, %v2308_v43  ;;  %v1027_v50 = vsel %vm973_vm4, %v1011_v11, %v2309_v12  ;;  %v2412_v8 = vpop.permute.xlu1 %2411  ;;  %1455 = vmatmul.mubr.bf16.gmra.mrb[4].mxu1 %v1225_v1  ;;  %v2318_v6 = vunpack.i.l.bf16 %v3479_v51  ;;  %v2571_v46 = vld [vmem:[%s3967_s5 + $0x4c] ss:$12 sps:$4 sm:$0xff]  }
 0x3c9   :  { %v1045_v2 = vpack.c.bf16 %v1027_v50, %v1026_v58  ;;  %v2414_v4 = vunpack.i.h.bf16 %v2412_v8  ;;  %v2413_v27 = vunpack.i.l.bf16 %v2412_v8  ;;  %v2419_v52 = vunpack.i.h.bf16 %v2417_v22 }
 0x3ca   :  { %v2418_v41 = vunpack.i.l.bf16 %v2417_v22 }
 0x3cb   :  { %v1229_v61 = vmul.bf16 %v2568_v16, %v1045_v2  ;;  %v978_v12 = vsel %vm973_vm4, %v961_v36, %v2413_v27  ;;  %v979_v42 = vsel %vm973_vm4, %v962_v63, %v2414_v4  ;;  %v997_v18 = vsel %vm939_vm1, %v3084_v24, %v2419_v52  ;;  %v2573_v27 = vld [vmem:[%s3967_s5 + $0x48] ss:$12 sps:$4 sm:$0xff]  }
 0x3cc   :  { %v2422_v17 = vpop.permute.xlu0 %2421  ;;  %v2427_v59 = vpop.permute.xlu1 %2426  ;;  %v1044_v19 = vpack.c.bf16 %v979_v42, %v978_v12  ;;  %v996_v43 = vsel %vm939_vm1, %v3065_v39, %v2418_v41  ;;  %v947_v24 = vsel %vm939_vm1, %v3350_v62, %v2314_v30  ;;  %v946_v39 = vsel %vm939_vm1, %v3354_v54, %v2313_v29 }
 0x3cd   :  { %v2424_v32 = vunpack.i.h.bf16 %v2422_v17  ;;  %v2423_v48 = vunpack.i.l.bf16 %v2422_v17  ;;  %1462 = vmatprep.mubr.bf16.mxu1 %v1229_v61  ;;  %v2429_v56 = vunpack.i.h.bf16 %v2427_v59  ;;  %v2428_v55 = vunpack.i.l.bf16 %v2427_v59 }
 0x3ce   :  { %v1228_v15 = vmul.bf16 %v2570_v10, %v1044_v19  ;;  %v2329_v62 = vunpack.i.h.bf16 %v3483_v21  ;;  %v2324_v54 = vunpack.i.h.bf16 %v3485_v31  ;;  %v2323_v36 = vunpack.i.l.bf16 %v3485_v31  ;;  %v2574_v19 = vld [vmem:[%s3967_s5 + $0x64] ss:$12 sps:$4 sm:$0xff]  }
 0x3cf   :  { %v1012_v28 = vsel %vm956_vm3, %v996_v43, %v2423_v48  ;;  %v1013_v34 = vsel %vm956_vm3, %v997_v18, %v2424_v32  ;;  %v964_v8 = vsel %vm956_vm3, %v947_v24, %v2429_v56  ;;  %v963_v2 = vsel %vm956_vm3, %v946_v39, %v2428_v55 }
 0x3d0   :  { %v2437_v11 = vpop.permute.xlu0 %2436  ;;  %v1028_v51 = vsel %vm973_vm4, %v1012_v28, %v2318_v6  ;;  %v1029_v1 = vsel %vm973_vm4, %v1013_v34, %v2319_v44  ;;  %v2432_v16 = vpop.permute.xlu1 %2431  ;;  %1463 = vmatmul.mubr.bf16.gmra.mrb[8].mxu1 %v1228_v15  ;;  %v2328_v12 = vunpack.i.l.bf16 %v3483_v21 }
 0x3d1   :  { %v1048_v22 = vpack.c.bf16 %v1029_v1, %v1028_v51  ;;  %v2434_v58 = vunpack.i.h.bf16 %v2432_v16  ;;  %v2433_v50 = vunpack.i.l.bf16 %v2432_v16  ;;  %v2439_v14 = vunpack.i.h.bf16 %v2437_v11  ;;  %v2576_v1 = vld [vmem:[%s3967_s5 + $0x60] ss:$12 sps:$4 sm:$0xff]  }
 0x3d2   :  { %v2438_v20 = vunpack.i.l.bf16 %v2437_v11 }
 0x3d3   :  { %v1232_v4 = vmul.bf16 %v2571_v46, %v1048_v22  ;;  %v980_v52 = vsel %vm973_vm4, %v963_v2, %v2433_v50  ;;  %v981_v41 = vsel %vm973_vm4, %v964_v8, %v2434_v58  ;;  %v999_v42 = vsel %vm939_vm1, %v3096_v37, %v2439_v14 }
 0x3d4   :  { %v2442_v63 = vpop.permute.xlu0 %2441  ;;  %v2447_v61 = vpop.permute.xlu1 %2446  ;;  %v1047_v30 = vpack.c.bf16 %v981_v41, %v980_v52  ;;  %v998_v17 = vsel %vm939_vm1, %v3099_v38, %v2438_v20  ;;  %v949_v37 = vsel %vm939_vm1, %v3372_v45, %v2324_v54  ;;  %v948_v38 = vsel %vm939_vm1, %v3376_v25, %v2323_v36  ;;  %v2577_v41 = vld [vmem:[%s3967_s5 + $0x7c] ss:$12 sps:$4 sm:$0xff]  }
 0x3d5   :  { %v2444_v10 = vunpack.i.h.bf16 %v2442_v63  ;;  %v2443_v44 = vunpack.i.l.bf16 %v2442_v63  ;;  %1470 = vmatprep.mubr.bf16.mxu1 %v1232_v4  ;;  %v2449_v29 = vunpack.i.h.bf16 %v2447_v61  ;;  %v2448_v59 = vunpack.i.l.bf16 %v2447_v61 }
 0x3d6   :  { %v1231_v31 = vmul.bf16 %v2573_v27, %v1047_v30  ;;  %v2339_v45 = vunpack.i.h.bf16 %v3487_v13  ;;  %v2334_v25 = vunpack.i.h.bf16 %v3489_v49  ;;  %v2333_v22 = vunpack.i.l.bf16 %v3489_v49 }
 0x3d7   :  { %v1014_v32 = vsel %vm956_vm3, %v998_v17, %v2443_v44  ;;  %v1015_v48 = vsel %vm956_vm3, %v999_v42, %v2444_v10  ;;  %v966_v46 = vsel %vm956_vm3, %v949_v37, %v2449_v29  ;;  %v965_v11 = vsel %vm956_vm3, %v948_v38, %v2448_v59 }
 0x3d8   :  { %v2457_v6 = vpop.permute.xlu0 %2456  ;;  %v1030_v21 = vsel %vm973_vm4, %v1014_v32, %v2328_v12  ;;  %v1031_v18 = vsel %vm973_vm4, %v1015_v48, %v2329_v62  ;;  %v2452_v43 = vpop.permute.xlu1 %2451  ;;  %1471 = vmatmul.mubr.bf16.gmra.mrb[12].mxu1 %v1231_v31  ;;  %v2338_v8 = vunpack.i.l.bf16 %v3487_v13  ;;  %v2579_v32 = vld [vmem:[%s3967_s5 + $0x78] ss:$12 sps:$4 sm:$0xff]  }
 0x3d9   :  { %v1051_v56 = vpack.c.bf16 %v1031_v18, %v1030_v21  ;;  %v2454_v55 = vunpack.i.h.bf16 %v2452_v43  ;;  %v2453_v28 = vunpack.i.l.bf16 %v2452_v43  ;;  %v2459_v34 = vunpack.i.h.bf16 %v2457_v6 }
 0x3da   :  { %v2458_v15 = vunpack.i.l.bf16 %v2457_v6  ;;  %v2344_v6 = vunpack.i.h.bf16 %v3493_v3  ;;  %v2343_v43 = vunpack.i.l.bf16 %v3493_v3 }
 0x3db   :  { %v1235_v51 = vmul.bf16 %v2574_v19, %v1051_v56  ;;  %v982_v24 = vsel %vm973_vm4, %v965_v11, %v2453_v28  ;;  %v983_v39 = vsel %vm973_vm4, %v966_v46, %v2454_v55  ;;  %v1001_v2 = vsel %vm939_vm1, %v3125_v0, %v2459_v34  ;;  %v2580_v11 = vld [vmem:[%s3967_s5 + $0x94] ss:$12 sps:$4 sm:$0xff]  }
 0x3dc   :  { %v2462_v16 = vpop.permute.xlu0 %2461  ;;  %v2467_v58 = vpop.permute.xlu1 %2466  ;;  %v1050_v20 = vpack.c.bf16 %v983_v39, %v982_v24  ;;  %v1000_v4 = vsel %vm939_vm1, %v3105_v57, %v2458_v15  ;;  %v951_v0 = vsel %vm939_vm1, %v3394_v33, %v2334_v25  ;;  %v950_v57 = vsel %vm939_vm1, %v3398_v7, %v2333_v22 }
 0x3dd   :  { %v2464_v50 = vunpack.i.h.bf16 %v2462_v16  ;;  %v2463_v14 = vunpack.i.l.bf16 %v2462_v16  ;;  %1478 = vmatprep.mubr.bf16.mxu1 %v1235_v51  ;;  %v2469_v27 = vunpack.i.h.bf16 %v2467_v58  ;;  %v2468_v62 = vunpack.i.l.bf16 %v2467_v58 }
 0x3de   :  { %v1234_v49 = vmul.bf16 %v2576_v1, %v1050_v20  ;;  %v2349_v33 = vunpack.i.h.bf16 %v3491_v23  ;;  %v2348_v7 = vunpack.i.l.bf16 %v3491_v23  ;;  %v952_v25 = vsel %vm939_vm1, %v3420_v35, %v2343_v43 }
 0x3df   :  { %v1016_v54 = vsel %vm956_vm3, %v1000_v4, %v2463_v14  ;;  %v1017_v52 = vsel %vm956_vm3, %v1001_v2, %v2464_v50  ;;  %v968_v17 = vsel %vm956_vm3, %v951_v0, %v2469_v27  ;;  %v967_v29 = vsel %vm956_vm3, %v950_v57, %v2468_v62  ;;  %v2582_v50 = vld [vmem:[%s3967_s5 + $0x90] ss:$12 sps:$4 sm:$0xff]   ;;  %v3975_v57 = vld [vmem:[#allocation2_spill] sm:$0xff] }
 0x3e0   :  { %v2477_v63 = vpop.permute.xlu0 %2476  ;;  %v1032_v13 = vsel %vm973_vm4, %v1016_v54, %v2338_v8  ;;  %v1033_v36 = vsel %vm973_vm4, %v1017_v52, %v2339_v45  ;;  %v2472_v61 = vpop.permute.xlu1 %2471  ;;  %1479 = vmatmul.mubr.bf16.gmra.mrb[16].mxu1 %v1234_v49  ;;  %v2354_v14 = vunpack.i.h.bf16 %v3495_v26  ;;  %v2353_v20 = vunpack.i.l.bf16 %v3495_v26 }
 0x3e1   :  { %v1054_v10 = vpack.c.bf16 %v1033_v36, %v1032_v13  ;;  %v2474_v44 = vunpack.i.h.bf16 %v2472_v61  ;;  %v2473_v30 = vunpack.i.l.bf16 %v2472_v61  ;;  %v2479_v12 = vunpack.i.h.bf16 %v2477_v63 }
 0x3e2   :  { %v2478_v42 = vunpack.i.l.bf16 %v2477_v63  ;;  %v955_v13 = vsel %vm939_vm1, %v3438_v5, %v2354_v14  ;;  %v954_v26 = vsel %vm939_vm1, %v3442_v47, %v2353_v20  ;;  %v2583_v47 = vld [vmem:[%s3967_s5 + $0xac] ss:$12 sps:$4 sm:$0xff]  }
 0x3e3   :  { %v1238_v59 = vmul.bf16 %v2577_v41, %v1054_v10  ;;  %v984_v48 = vsel %vm973_vm4, %v967_v29, %v2473_v30  ;;  %v985_v31 = vsel %vm973_vm4, %v968_v17, %v2474_v44  ;;  %v1003_v56 = vsel %vm939_vm1, %v3160_v9, %v2479_v12  ;;  %v1852_v14 = vld [vmem:[%s3968_s8 + $0x28] sm:$0xff] }
 0x3e4   :  { %v2482_v19 = vpop.permute.xlu0 %2481  ;;  %v2487_v21 = vpop.permute.xlu1 %2486  ;;  %v1053_v38 = vpack.c.bf16 %v985_v31, %v984_v48  ;;  %v1002_v23 = vsel %vm939_vm1, %v3169_v40, %v2478_v42  ;;  %v953_v40 = vsel %vm939_vm1, %v3416_v53, %v2344_v6 }
 0x3e5   :  { %v2484_v18 = vunpack.i.h.bf16 %v2482_v19  ;;  %v2483_v37 = vunpack.i.l.bf16 %v2482_v19  ;;  %1486 = vmatprep.mubr.bf16.mxu1 %v1238_v59  ;;  %v2489_v55 = vunpack.i.h.bf16 %v2487_v21  ;;  %v2488_v28 = vunpack.i.l.bf16 %v2487_v21 }
 0x3e6   :  { %v1237_v46 = vmul.bf16 %v2579_v32, %v1053_v38 }
 0x3e7   :  { %v1018_v34 = vsel %vm956_vm3, %v1002_v23, %v2483_v37  ;;  %v1019_v15 = vsel %vm956_vm3, %v1003_v56, %v2484_v18  ;;  %v970_v16 = vsel %vm956_vm3, %v953_v40, %v2489_v55  ;;  %v969_v22 = vsel %vm956_vm3, %v952_v25, %v2488_v28  ;;  %v1847_v40 = vld [vmem:[%s3968_s8] sm:$0xff]  ;;  %v1848_v25 = vld [vmem:[%s3968_s8 + $0x8] sm:$0xff] }
 0x3e8   :  { %v2497_v51 = vpop.permute.xlu0 %2496  ;;  %v1034_v3 = vsel %vm973_vm4, %v1018_v34, %v2348_v7  ;;  %v1035_v1 = vsel %vm973_vm4, %v1019_v15, %v2349_v33  ;;  %v2492_v9 = vpop.permute.xlu1 %2491  ;;  %1487 = vmatmul.mubr.bf16.gmra.mrb[20].mxu1 %v1237_v46  ;;  %v2585_v33 = vld [vmem:[%s3967_s5 + $0xa8] ss:$12 sps:$4 sm:$0xff]  }
 0x3e9   :  { %v1057_v45 = vpack.c.bf16 %v1035_v1, %v1034_v3  ;;  %v2494_v24 = vunpack.i.h.bf16 %v2492_v9  ;;  %v2493_v39 = vunpack.i.l.bf16 %v2492_v9  ;;  %v2499_v2 = vunpack.i.h.bf16 %v2497_v51 }
 0x3ea   :  { %v2498_v4 = vunpack.i.l.bf16 %v2497_v51 }
 0x3eb   :  { %v1241_v58 = vmul.bf16 %v2580_v11, %v1057_v45  ;;  %v986_v53 = vsel %vm973_vm4, %v969_v22, %v2493_v39  ;;  %v987_v8 = vsel %vm973_vm4, %v970_v16, %v2494_v24  ;;  %v1005_v0 = vsel %vm939_vm1, %v3035_v60, %v2499_v2  ;;  %v1849_v24 = vld [vmem:[%s3968_s8 + $0x10] sm:$0xff]  ;;  %v1850_v22 = vld [vmem:[%s3968_s8 + $0x18] sm:$0xff] }
 0x3ec   :  { %v2502_v35 = vpop.permute.xlu0 %2501  ;;  %v2507_v27 = vpop.permute.xlu1 %2506  ;;  %v1056_v62 = vpack.c.bf16 %v987_v8, %v986_v53  ;;  %v1004_v61 = vsel %vm939_vm1, %v3975_v57, %v2498_v4  ;;  %v2593_v45 = vmov 0.0|0.0   ;;  %v2595_v39 = vmov 0.0   ;;  %v1853_v53 = vld [vmem:[%s3968_s8 + $0x30] sm:$0xff]  ;;  %v1854_v8 = vld [vmem:[%s3968_s8 + $0x38] sm:$0xff] }
 0x3ed   :  { %1494 = vmatprep.mubr.bf16.mxu1 %v1241_v58  ;;  %v2504_v54 = vunpack.i.h.bf16 %v2502_v35  ;;  %v2503_v52 = vunpack.i.l.bf16 %v2502_v35  ;;  %v2509_v49 = vunpack.i.h.bf16 %v2507_v27  ;;  %v2508_v41 = vunpack.i.l.bf16 %v2507_v27  ;;  %2182 = vmatprep.subr.bf16.mxu0 %v2593_v45 }
 0x3ee   :  { %v1240_v63 = vmul.bf16 %v2582_v50, %v1056_v62  ;;  %2179 = vmatprep.mubr.msk.f32.mxu0 %vm2594_vm5, %v2595_v39  ;;  %v2183_v16 = vpack.c.bf16 %v1848_v25, %v1847_v40  ;;  %v2186_v58 = vpack.c.bf16 %v1850_v22, %v1849_v24  ;;  %v1851_v50 = vld [vmem:[%s3968_s8 + $0x20] sm:$0xff]  ;;  %v2192_v35 = vpack.c.bf16 %v1854_v8, %v1853_v53 }
 0x3ef   :  { %v1020_v12 = vsel %vm956_vm3, %v1004_v61, %v2503_v52  ;;  %v1021_v42 = vsel %vm956_vm3, %v1005_v0, %v2504_v54  ;;  %v972_v29 = vsel %vm956_vm3, %v955_v13, %v2509_v49  ;;  %v971_v60 = vsel %vm956_vm3, %v954_v26, %v2508_v41 }
 0x3f0   :  { %v2512_v36 = vpop.permute.xlu0 %2511  ;;  %v2517_v10 = vpop.permute.xlu1 %2516  ;;  %1495 = vmatmul.mubr.bf16.gmra.mrb[24].mxu1 %v1240_v63  ;;  %2184 = vmatpush3.bf16.msra.mxu0 %v2183_v16  ;;  %v2189_v20 = vpack.c.bf16 %v1852_v14, %v1851_v50 }
 0x3f1   :  { %v2514_v44 = vunpack.i.h.bf16 %v2512_v36  ;;  %v2513_v30 = vunpack.i.l.bf16 %v2512_v36  ;;  %v2519_v17 = vunpack.i.h.bf16 %v2517_v10  ;;  %v2518_v5 = vunpack.i.l.bf16 %v2517_v10  ;;  %2185 = vmatprep.subr.bf16.mxu0 %v2593_v45 }
 0x3f3   :  { %v1036_v59 = vsel %vm973_vm4, %v1020_v12, %v2513_v30  ;;  %v1037_v32 = vsel %vm973_vm4, %v1021_v42, %v2514_v44  ;;  %v988_v7 = vsel %vm973_vm4, %v971_v60, %v2518_v5  ;;  %v989_v48 = vsel %vm973_vm4, %v972_v29, %v2519_v17 }
 0x3f4   :  { %v1060_v31 = vpack.c.bf16 %v1037_v32, %v1036_v59  ;;  %v1059_v19 = vpack.c.bf16 %v989_v48, %v988_v7  ;;  %2187 = vmatpush3.bf16.msra.mxu0 %v2186_v58 }
 0x3f5   :  { %2188 = vmatprep.subr.bf16.mxu0 %v2593_v45 }
 0x3f6   :  { %v1244_v6 = vmul.bf16 %v2583_v47, %v1060_v31  ;;  %v1243_v21 = vmul.bf16 %v2585_v33, %v1059_v19 }
 0x3f8   :  { %1502 = vmatprep.mubr.bf16.mxu1 %v1244_v6  ;;  %2190 = vmatpush3.bf16.msra.mxu0 %v2189_v20 }
 0x3f9   :  { %1503 = vmatmul.mubr.bf16.gmra.mrb[28].mxu1 %v1243_v21  ;;  %2191 = vmatprep.subr.bf16.mxu0 %v2593_v45 }
 0x3fc   :  { %2193 = vmatpush3.bf16.msra.mxu0 %v2192_v35 }
 0x400   :  { %v2149_v18 = vpop.f32.mrb[16].mxu0 }
 0x401   :  { %v1545_v37 = vpop.f32.mrb[17].mxu0 }
 0x402   :  { %v3698_v38 = vpop.f32.mrb[18].mxu0 }
 0x403   :  { %v1548_v43 = vpop.f32.mrb[19].mxu0 }
 0x408   :  { %v3700_v56 = vpop.f32.mrb[20].mxu0 }
 0x409   :  { %v3702_v23 = vpop.f32.mrb[21].mxu0 }
 0x40a   :  { %v3704_v55 = vpop.f32.mrb[22].mxu0 }
 0x40b   :  { %v3706_v28 = vpop.f32.mrb[23].mxu0 }
 0x410   :  { %v3708_v34 = vpop.f32.mrb[24].mxu0 }
 0x411   :  { %v3710_v15 = vpop.f32.mrb[25].mxu0 }
 0x412   :  { %v3712_v46 = vpop.f32.mrb[26].mxu0 }
 0x413   :  { %v3714_v11 = vpop.f32.mrb[27].mxu0 }
 0x418   :  { %v3716_v51 = vpop.f32.mrb[28].mxu0 }
 0x419   :  { %v3718_v3 = vpop.f32.mrb[29].mxu0 }
 0x41a   :  { %v3720_v1 = vpop.f32.mrb[30].mxu0 }
 0x41b   :  { %v3722_v9 = vpop.f32.mrb[31].mxu0 }
 0x493   :  { %v2044_v2 = vpop.f32.mrb[0].mxu1 }
 0x494   :  { %v2045_v4 = vpop.f32.mrb[1].mxu1 }
 0x495   :  { %v2046_v27 = vadd.f32 %v2045_v4, %v2044_v2  ;;  %v2047_v62 = vpop.f32.mrb[2].mxu1 }
 0x496   :  { %v2048_v54 = vpop.f32.mrb[3].mxu1 }
 0x497   :  { %v3748_v52 = vadd.f32 %v2046_v27, %v1545_v37  ;;  %v2049_v49 = vadd.f32 %v2048_v54, %v2047_v62 }
 0x499   :  { %v1645_v41 = vmul.f32 %v3748_v52, %v3748_v52  ;;  %v3752_v63 = vadd.f32 %v2049_v49, %v1548_v43  ;;  %v1608_v13 = vsel %vm956_vm3, %v3748_v52, 0.0 }
 0x49b   :  { %v1609_v26 = vsel %vm956_vm3, %v3752_v63, 0.0  ;;  %v1646_v36 = vmul.f32 %v3752_v63, %v3752_v63  ;;  %v2050_v0 = vpop.f32.mrb[4].mxu1  ;;  %v1661_v10 = vsel %vm956_vm3, %v1645_v41, 0.0 }
 0x49c   :  { %v1610_v57 = vadd.f32 %v1609_v26, %v1608_v13  ;;  %v2051_v61 = vpop.f32.mrb[5].mxu1 }
 0x49d   :  { %v1662_v44 = vsel %vm956_vm3, %v1646_v36, 0.0  ;;  %v2052_v30 = vadd.f32 %v2051_v61, %v2050_v0  ;;  %v2053_v12 = vpop.f32.mrb[6].mxu1 }
 0x49e   :  { %v1663_v42 = vadd.f32 %v1662_v44, %v1661_v10  ;;  %v2054_v17 = vpop.f32.mrb[7].mxu1 }
 0x49f   :  { %v3762_v5 = vadd.f32 %v2149_v18, %v2052_v30  ;;  %v2055_v47 = vadd.f32 %v2054_v17, %v2053_v12 }
 0x4a1   :  { %v1611_v29 = vsel %vm956_vm3, %v3762_v5, 0.0  ;;  %v1647_v60 = vmul.f32 %v3762_v5, %v3762_v5  ;;  %v3769_v59 = vadd.f32 %v3698_v38, %v2055_v47 }
 0x4a2   :  { %v1612_v32 = vadd.f32 %v1611_v29, %v1610_v57 }
 0x4a3   :  { %v1664_v33 = vsel %vm956_vm3, %v1647_v60, 0.0  ;;  %v1613_v7 = vsel %vm956_vm3, %v3769_v59, 0.0  ;;  %v1648_v48 = vmul.f32 %v3769_v59, %v3769_v59  ;;  %v2056_v31 = vpop.f32.mrb[8].mxu1 }
 0x4a4   :  { %v1665_v19 = vadd.f32 %v1664_v33, %v1663_v42  ;;  %v1614_v6 = vadd.f32 %v1613_v7, %v1612_v32  ;;  %v2057_v21 = vpop.f32.mrb[9].mxu1 }
 0x4a5   :  { %v1666_v18 = vsel %vm956_vm3, %v1648_v48, 0.0  ;;  %v2058_v37 = vadd.f32 %v2057_v21, %v2056_v31  ;;  %v2059_v43 = vpop.f32.mrb[10].mxu1 }
 0x4a6   :  { %v1667_v45 = vadd.f32 %v1666_v18, %v1665_v19  ;;  %v2060_v38 = vpop.f32.mrb[11].mxu1 }
 0x4a7   :  { %v3778_v40 = vadd.f32 %v2058_v37, %v3702_v23  ;;  %v2061_v25 = vadd.f32 %v2060_v38, %v2059_v43 }
 0x4a9   :  { %v1615_v24 = vsel %vm956_vm3, %v3778_v40, 0.0  ;;  %v1649_v39 = vmul.f32 %v3778_v40, %v3778_v40  ;;  %v3785_v16 = vadd.f32 %v2061_v25, %v3706_v28 }
 0x4aa   :  { %v1616_v22 = vadd.f32 %v1615_v24, %v1614_v6 }
 0x4ab   :  { %v1668_v58 = vsel %vm956_vm3, %v1649_v39, 0.0  ;;  %v1617_v50 = vsel %vm956_vm3, %v3785_v16, 0.0  ;;  %v1650_v23 = vmul.f32 %v3785_v16, %v3785_v16  ;;  %v2062_v14 = vpop.f32.mrb[12].mxu1 }
 0x4ac   :  { %v1669_v20 = vadd.f32 %v1668_v58, %v1667_v45  ;;  %v1618_v53 = vadd.f32 %v1617_v50, %v1616_v22  ;;  %v2063_v8 = vpop.f32.mrb[13].mxu1 }
 0x4ad   :  { %v1670_v35 = vsel %vm956_vm3, %v1650_v23, 0.0  ;;  %v2064_v2 = vadd.f32 %v2063_v8, %v2062_v14  ;;  %v2065_v4 = vpop.f32.mrb[14].mxu1 }
 0x4ae   :  { %v1671_v27 = vadd.f32 %v1670_v35, %v1669_v20  ;;  %v2066_v28 = vpop.f32.mrb[15].mxu1 }
 0x4af   :  { %v3794_v62 = vadd.f32 %v3700_v56, %v2064_v2  ;;  %v2067_v54 = vadd.f32 %v2066_v28, %v2065_v4 }
 0x4b1   :  { %v1619_v49 = vsel %vm956_vm3, %v3794_v62, 0.0  ;;  %v1651_v41 = vmul.f32 %v3794_v62, %v3794_v62  ;;  %v3801_v13 = vadd.f32 %v3704_v55, %v2067_v54 }
 0x4b2   :  { %v1620_v26 = vadd.f32 %v1619_v49, %v1618_v53 }
 0x4b3   :  { %v1672_v36 = vsel %vm956_vm3, %v1651_v41, 0.0  ;;  %v1621_v0 = vsel %vm956_vm3, %v3801_v13, 0.0  ;;  %v1652_v56 = vmul.f32 %v3801_v13, %v3801_v13  ;;  %v2068_v57 = vpop.f32.mrb[16].mxu1 }
 0x4b4   :  { %v1673_v61 = vadd.f32 %v1672_v36, %v1671_v27  ;;  %v1622_v10 = vadd.f32 %v1621_v0, %v1620_v26  ;;  %v2069_v44 = vpop.f32.mrb[17].mxu1 }
 0x4b5   :  { %v1674_v30 = vsel %vm956_vm3, %v1652_v56, 0.0  ;;  %v2070_v12 = vadd.f32 %v2069_v44, %v2068_v57  ;;  %v2071_v42 = vpop.f32.mrb[18].mxu1 }
 0x4b6   :  { %v1675_v17 = vadd.f32 %v1674_v30, %v1673_v61  ;;  %v2072_v55 = vpop.f32.mrb[19].mxu1 }
 0x4b7   :  { %v3810_v47 = vadd.f32 %v2070_v12, %v3710_v15  ;;  %v2073_v29 = vadd.f32 %v2072_v55, %v2071_v42 }
 0x4b9   :  { %v1623_v60 = vsel %vm956_vm3, %v3810_v47, 0.0  ;;  %v1653_v32 = vmul.f32 %v3810_v47, %v3810_v47  ;;  %v3817_v33 = vadd.f32 %v2073_v29, %v3714_v11 }
 0x4ba   :  { %v1624_v7 = vadd.f32 %v1623_v60, %v1622_v10 }
 0x4bb   :  { %v1676_v48 = vsel %vm956_vm3, %v1653_v32, 0.0  ;;  %v1625_v31 = vsel %vm956_vm3, %v3817_v33, 0.0  ;;  %v1654_v15 = vmul.f32 %v3817_v33, %v3817_v33  ;;  %v2074_v19 = vpop.f32.mrb[20].mxu1 }
 0x4bc   :  { %v1677_v6 = vadd.f32 %v1676_v48, %v1675_v17  ;;  %v1626_v21 = vadd.f32 %v1625_v31, %v1624_v7  ;;  %v2075_v18 = vpop.f32.mrb[21].mxu1 }
 0x4bd   :  { %v1678_v37 = vsel %vm956_vm3, %v1654_v15, 0.0  ;;  %v2076_v43 = vadd.f32 %v2075_v18, %v2074_v19  ;;  %v2077_v45 = vpop.f32.mrb[22].mxu1 }
 0x4be   :  { %v1679_v38 = vadd.f32 %v1678_v37, %v1677_v6  ;;  %v2078_v11 = vpop.f32.mrb[23].mxu1 }
 0x4bf   :  { %v3826_v25 = vadd.f32 %v3708_v34, %v2076_v43  ;;  %v2079_v24 = vadd.f32 %v2078_v11, %v2077_v45 }
 0x4c1   :  { %v1627_v39 = vsel %vm956_vm3, %v3826_v25, 0.0  ;;  %v1655_v22 = vmul.f32 %v3826_v25, %v3826_v25  ;;  %v3833_v58 = vadd.f32 %v3712_v46, %v2079_v24 }
 0x4c2   :  { %v1628_v50 = vadd.f32 %v1627_v39, %v1626_v21 }
 0x4c3   :  { %v1680_v23 = vsel %vm956_vm3, %v1655_v22, 0.0  ;;  %v1629_v14 = vsel %vm956_vm3, %v3833_v58, 0.0  ;;  %v1656_v34 = vmul.f32 %v3833_v58, %v3833_v58  ;;  %v2080_v20 = vpop.f32.mrb[24].mxu1 }
 0x4c4   :  { %v1681_v53 = vadd.f32 %v1680_v23, %v1679_v38  ;;  %v1630_v8 = vadd.f32 %v1629_v14, %v1628_v50  ;;  %v2081_v35 = vpop.f32.mrb[25].mxu1 }
 0x4c5   :  { %v1682_v2 = vsel %vm956_vm3, %v1656_v34, 0.0  ;;  %v2082_v4 = vadd.f32 %v2081_v35, %v2080_v20  ;;  %v2083_v27 = vpop.f32.mrb[26].mxu1 }
 0x4c6   :  { %v1683_v28 = vadd.f32 %v1682_v2, %v1681_v53  ;;  %v2084_v46 = vpop.f32.mrb[27].mxu1 }
 0x4c7   :  { %v3842_v54 = vadd.f32 %v2082_v4, %v3718_v3  ;;  %v2085_v49 = vadd.f32 %v2084_v46, %v2083_v27 }
 0x4c9   :  { %v1631_v41 = vsel %vm956_vm3, %v3842_v54, 0.0  ;;  %v1657_v26 = vmul.f32 %v3842_v54, %v3842_v54  ;;  %v3849_v36 = vadd.f32 %v2085_v49, %v3722_v9 }
 0x4ca   :  { %v1632_v0 = vadd.f32 %v1631_v41, %v1630_v8 }
 0x4cb   :  { %v1684_v56 = vsel %vm956_vm3, %v1657_v26, 0.0  ;;  %v1633_v57 = vsel %vm956_vm3, %v3849_v36, 0.0  ;;  %v1658_v3 = vmul.f32 %v3849_v36, %v3849_v36 }
 0x4cc   :  { %v2086_v61 = vpop.f32.mrb[28].mxu1  ;;  %v1685_v10 = vadd.f32 %v1684_v56, %v1683_v28  ;;  %v1634_v44 = vadd.f32 %v1633_v57, %v1632_v0 }
 0x4cd   :  { %v2087_v30 = vpop.f32.mrb[29].mxu1  ;;  %v1686_v12 = vsel %vm956_vm3, %v1658_v3, 0.0 }
 0x4ce   :  { %v2088_v42 = vadd.f32 %v2087_v30, %v2086_v61  ;;  %v2089_v17 = vpop.f32.mrb[30].mxu1  ;;  %v1687_v55 = vadd.f32 %v1686_v12, %v1685_v10 }
 0x4cf   :  { %v2090_v9 = vpop.f32.mrb[31].mxu1 }
 0x4d0   :  { %v1602_v29 = vadd.f32 %v3716_v51, %v2088_v42  ;;  %v2091_v60 = vadd.f32 %v2090_v9, %v2089_v17 }
 0x4d2   :  { %v1635_v32 = vsel %vm956_vm3, %v1602_v29, 0.0  ;;  %v1659_v7 = vmul.f32 %v1602_v29, %v1602_v29  ;;  %v1605_v48 = vadd.f32 %v3720_v1, %v2091_v60 }
 0x4d3   :  { %v1636_v31 = vadd.f32 %v1635_v32, %v1634_v44 }
 0x4d4   :  { %v1688_v15 = vsel %vm956_vm3, %v1659_v7, 0.0  ;;  %v1637_v19 = vsel %vm956_vm3, %v1605_v48, 0.0  ;;  %v1660_v6 = vmul.f32 %v1605_v48, %v1605_v48 }
 0x4d5   :  { %v1689_v21 = vadd.f32 %v1688_v15, %v1687_v55  ;;  %v1638_v18 = vadd.f32 %v1637_v19, %v1636_v31 }
 0x4d6   :  { %v1690_v37 = vsel %vm956_vm3, %v1660_v6, 0.0 }
 0x4d7   :  { %v1639_v43 = vrot.slane %v1638_v18, 4  ;;  %v1691_v45 = vadd.f32 %v1690_v37, %v1689_v21 }
 0x4d9   :  { %v1640_v38 = vadd.f32 %v1639_v43, %v1638_v18  ;;  %v1692_v51 = vrot.slane %v1691_v45, 4 }
 0x4db   :  { %v1641_v11 = vrot.slane %v1640_v38, 2  ;;  %v1693_v24 = vadd.f32 %v1692_v51, %v1691_v45 }
 0x4dd   :  { %v1642_v39 = vadd.f32 %v1641_v11, %v1640_v38  ;;  %v1694_v22 = vrot.slane %v1693_v24, 2 }
 0x4df   :  { %v1643_v50 = vrot.slane %v1642_v39, 1  ;;  %v1695_v1 = vadd.f32 %v1694_v22, %v1693_v24 }
 0x4e1   :  { %v1644_v23 = vadd.f32 %v1643_v50, %v1642_v39  ;;  %v1696_v14 = vrot.slane %v1695_v1, 1 }
 0x4e3   :  { %v1697_v34 = vadd.f32 %v1696_v14, %v1695_v1  ;;  %v3863_v20 = vmul.f32 0.0078125, %v1644_v23 }
 0x4e5   :  { %v1699_v53 = vmul.f32 0.0078125, %v1697_v34  ;;  %v1700_v8 = vmul.f32 %v3863_v20, %v3863_v20  ;;  %v1710_v35 = vsub.f32 %v3810_v47, %v3863_v20  ;;  %v1711_v2 = vsub.f32 %v3817_v33, %v3863_v20 }
 0x4e6   :  { %v1712_v4 = vsub.f32 %v3826_v25, %v3863_v20  ;;  %v1713_v27 = vsub.f32 %v3833_v58, %v3863_v20  ;;  %v1714_v28 = vsub.f32 %v3842_v54, %v3863_v20  ;;  %v1715_v46 = vsub.f32 %v3849_v36, %v3863_v20 }
 0x4e7   :  { %v1701_v49 = vsub.f32 %v1699_v53, %v1700_v8  ;;  %v1716_v41 = vsub.f32 %v1602_v29, %v3863_v20  ;;  %v1717_v47 = vsub.f32 %v1605_v48, %v3863_v20  ;;  %v1702_v33 = vsub.f32 %v3748_v52, %v3863_v20 }
 0x4e8   :  { %v1703_v25 = vsub.f32 %v3752_v63, %v3863_v20  ;;  %v1704_v58 = vsub.f32 %v3762_v5, %v3863_v20  ;;  %v1705_v54 = vsub.f32 %v3769_v59, %v3863_v20  ;;  %v1706_v26 = vsub.f32 %v3778_v40, %v3863_v20  ;;  %v3900_v5 = vld [vmem:[%s3969_s6] ss:$0 sm:$0xff] }
 0x4e9   :  { %v1718_v36 = vadd.f32 1e-05, %v1701_v49  ;;  %v1707_v0 = vsub.f32 %v3785_v16, %v3863_v20  ;;  %v1708_v56 = vsub.f32 %v3794_v62, %v3863_v20  ;;  %v1709_v52 = vsub.f32 %v3801_v13, %v3863_v20  ;;  %v3905_v62 = vld [vmem:[%s3970_s7] ss:$0 sm:$0xff] }
 0x4eb   :  { %2588 = vrsqrt.f32 %v1718_v36 }
 0x4f5   :  { %v2589_v63 = vpop.eup %2588 }
 0x4f6   :  { %v1728_v59 = vmul.f32 %v2589_v63, %v1710_v35  ;;  %v1729_v57 = vmul.f32 %v2589_v63, %v1711_v2  ;;  %v1730_v40 = vmul.f32 %v2589_v63, %v1712_v4  ;;  %v1731_v3 = vmul.f32 %v2589_v63, %v1713_v27 }
 0x4f7   :  { %v1732_v61 = vmul.f32 %v2589_v63, %v1714_v28  ;;  %v1733_v10 = vmul.f32 %v2589_v63, %v1715_v46  ;;  %v1734_v16 = vmul.f32 %v2589_v63, %v1716_v41  ;;  %v1735_v44 = vmul.f32 %v2589_v63, %v1717_v47 }
 0x4f8   :  { %v1751_v13 = vmul.f32 %v3900_v5, %v1728_v59  ;;  %v1752_v30 = vmul.f32 %v3900_v5, %v1729_v57  ;;  %v1753_v12 = vmul.f32 %v3900_v5, %v1730_v40  ;;  %v1754_v42 = vmul.f32 %v3900_v5, %v1731_v3 }
 0x4f9   :  { %v1755_v17 = vmul.f32 %v3900_v5, %v1732_v61  ;;  %v1756_v55 = vmul.f32 %v3900_v5, %v1733_v10  ;;  %v1757_v9 = vmul.f32 %v3900_v5, %v1734_v16  ;;  %v1758_v29 = vmul.f32 %v3900_v5, %v1735_v44 }
 0x4fa   :  { %v1774_v60 = vadd.f32 %v3905_v62, %v1751_v13  ;;  %v1775_v32 = vadd.f32 %v3905_v62, %v1752_v30  ;;  %v1776_v7 = vadd.f32 %v3905_v62, %v1753_v12  ;;  %v1777_v48 = vadd.f32 %v3905_v62, %v1754_v42 }
 0x4fb   :  { %v1778_v31 = vadd.f32 %v3905_v62, %v1755_v17  ;;  %v1779_v15 = vadd.f32 %v3905_v62, %v1756_v55  ;;  %v1780_v19 = vadd.f32 %v3905_v62, %v1757_v9  ;;  %v1781_v6 = vadd.f32 %v3905_v62, %v1758_v29 }
 0x4fc   :  { %v1790_v21 = vmax.f32 %v1774_v60, 0.0  ;;  %v1791_v18 = vmax.f32 %v1775_v32, 0.0  ;;  %v1792_v37 = vmax.f32 %v1776_v7, 0.0  ;;  %v1793_v43 = vmax.f32 %v1777_v48, 0.0 }
 0x4fd   :  { %v1794_v45 = vmax.f32 %v1778_v31, 0.0  ;;  %v1795_v38 = vmax.f32 %v1779_v15, 0.0  ;;  %v1796_v51 = vmax.f32 %v1780_v19, 0.0  ;;  %v1797_v11 = vmax.f32 %v1781_v6, 0.0 }
 0x4fe   :  { %v1819_v24 = vsel %vm956_vm3, %v1790_v21, -inf  ;;  %v1820_v39 = vsel %vm956_vm3, %v1791_v18, -inf  ;;  %v1821_v22 = vsel %vm956_vm3, %v1792_v37, -inf  ;;  %v1823_v50 = vsel %vm956_vm3, %v1793_v43, -inf }
 0x4ff   :  { %v1822_v1 = vmax.f32 %v1819_v24, %v1821_v22  ;;  %v1824_v23 = vmax.f32 %v1820_v39, %v1823_v50  ;;  %v1825_v14 = vsel %vm956_vm3, %v1794_v45, -inf  ;;  %v1827_v34 = vsel %vm956_vm3, %v1795_v38, -inf }
 0x500   :  { %v1829_v20 = vsel %vm956_vm3, %v1796_v51, -inf  ;;  %v1831_v53 = vsel %vm956_vm3, %v1797_v11, -inf  ;;  %v1720_v8 = vmul.f32 %v2589_v63, %v1702_v33  ;;  %v1721_v35 = vmul.f32 %v2589_v63, %v1703_v25 }
 0x501   :  { %v1826_v2 = vmax.f32 %v1822_v1, %v1825_v14  ;;  %v1828_v4 = vmax.f32 %v1824_v23, %v1827_v34  ;;  %v1722_v27 = vmul.f32 %v2589_v63, %v1704_v58  ;;  %v1723_v28 = vmul.f32 %v2589_v63, %v1705_v54 }
 0x502   :  { %v1724_v46 = vmul.f32 %v2589_v63, %v1706_v26  ;;  %v1725_v49 = vmul.f32 %v2589_v63, %v1707_v0  ;;  %v1726_v41 = vmul.f32 %v2589_v63, %v1708_v56  ;;  %v1727_v47 = vmul.f32 %v2589_v63, %v1709_v52 }
 0x503   :  { %v1830_v36 = vmax.f32 %v1826_v2, %v1829_v20  ;;  %v1832_v59 = vmax.f32 %v1828_v4, %v1831_v53  ;;  %v1743_v57 = vmul.f32 %v3900_v5, %v1720_v8  ;;  %v1744_v40 = vmul.f32 %v3900_v5, %v1721_v35  ;;  %v2010_v2 = vld [vmem:[%s3971_s9] ss:$0 sm:$0xff] }
 0x504   :  { %v1745_v3 = vmul.f32 %v3900_v5, %v1722_v27  ;;  %v1746_v61 = vmul.f32 %v3900_v5, %v1723_v28  ;;  %v1747_v33 = vmul.f32 %v3900_v5, %v1724_v46  ;;  %v1748_v25 = vmul.f32 %v3900_v5, %v1725_v49 }
 0x505   :  { %v1833_v58 = vmax.f32 %v1830_v36, %v1832_v59  ;;  %v1749_v54 = vmul.f32 %v3900_v5, %v1726_v41  ;;  %v1750_v26 = vmul.f32 %v3900_v5, %v1727_v47  ;;  %v1766_v0 = vadd.f32 %v3905_v62, %v1743_v57 }
 0x506   :  { %v1767_v56 = vadd.f32 %v3905_v62, %v1744_v40  ;;  %v1768_v52 = vadd.f32 %v3905_v62, %v1745_v3  ;;  %v1769_v63 = vadd.f32 %v3905_v62, %v1746_v61  ;;  %v1770_v10 = vadd.f32 %v3905_v62, %v1747_v33 }
 0x507   :  { %v1771_v16 = vadd.f32 %v3905_v62, %v1748_v25  ;;  %v1772_v44 = vadd.f32 %v3905_v62, %v1749_v54  ;;  %v1773_v13 = vadd.f32 %v3905_v62, %v1750_v26  ;;  %v1782_v30 = vmax.f32 %v1766_v0, 0.0 }
 0x508   :  { %v1783_v12 = vmax.f32 %v1767_v56, 0.0  ;;  %v1784_v42 = vmax.f32 %v1768_v52, 0.0  ;;  %v1785_v5 = vmax.f32 %v1769_v63, 0.0  ;;  %v1786_v17 = vmax.f32 %v1770_v10, 0.0 }
 0x509   :  { %v1787_v55 = vmax.f32 %v1771_v16, 0.0  ;;  %v1788_v9 = vmax.f32 %v1772_v44, 0.0  ;;  %v1798_v29 = vsel %vm956_vm3, %v1782_v30, -inf  ;;  %v1789_v60 = vmax.f32 %v1773_v13, 0.0 }
 0x50a   :  { %v1799_v32 = vsel %vm956_vm3, %v1783_v12, -inf  ;;  %v1800_v7 = vsel %vm956_vm3, %v1784_v42, -inf  ;;  %v1802_v48 = vsel %vm956_vm3, %v1785_v5, -inf  ;;  %v1804_v62 = vsel %vm956_vm3, %v1786_v17, -inf }
 0x50b   :  { %v1801_v31 = vmax.f32 %v1798_v29, %v1800_v7  ;;  %v1803_v15 = vmax.f32 %v1799_v32, %v1802_v48  ;;  %v1806_v19 = vsel %vm956_vm3, %v1787_v55, -inf  ;;  %v1834_v6 = vrot.slane %v1833_v58, 4 }
 0x50c   :  { %v1808_v37 = vsel %vm956_vm3, %v1788_v9, -inf  ;;  %v1810_v43 = vsel %vm956_vm3, %v1789_v60, -inf }
 0x50d   :  { %v1805_v21 = vmax.f32 %v1801_v31, %v1804_v62  ;;  %v1807_v18 = vmax.f32 %v1803_v15, %v1806_v19  ;;  %v1835_v45 = vmax.f32 %v1833_v58, %v1834_v6 }
 0x50f   :  { %v1809_v38 = vmax.f32 %v1805_v21, %v1808_v37  ;;  %v1811_v51 = vmax.f32 %v1807_v18, %v1810_v43  ;;  %v1836_v11 = vrot.slane %v1835_v45, 2 }
 0x511   :  { %v1812_v24 = vmax.f32 %v1809_v38, %v1811_v51  ;;  %v1837_v22 = vmax.f32 %v1835_v45, %v1836_v11 }
 0x513   :  { %v1813_v39 = vrot.slane %v1812_v24, 4  ;;  %v1838_v23 = vrot.slane %v1837_v22, 1 }
 0x515   :  { %v1814_v50 = vmax.f32 %v1812_v24, %v1813_v39  ;;  %v1839_v20 = vmax.f32 %v1837_v22, %v1838_v23 }
 0x517   :  { %v1815_v1 = vrot.slane %v1814_v50, 2 }
 0x519   :  { %v1816_v14 = vmax.f32 %v1814_v50, %v1815_v1 }
 0x51b   :  { %v1817_v34 = vrot.slane %v1816_v14, 1 }
 0x51d   :  { %v1818_v53 = vmax.f32 %v1816_v14, %v1817_v34 }
 0x51f   :  { %v1843_v8 = vsel %vm1842_vm6, %v1839_v20, %v1818_v53 }
 0x520   :  { %v1846_v35 = vsel %vm1845_vm7, %v1843_v8, 0.0 }
 0x521   :  { %2180 = vmatmul.mubr.msk.f32.vlgmr.msra.gmra.mrb[32].mxu0 %vm956_vm3, %v1846_v35 }
 0x5f4   :  { %v1931_v4 = vpop.f32.mrb[32].mxu0 }
 0x5f5   :  { %v1932_v27 = vadd.f32 %v2010_v2, %v1931_v4  ;;  %v2181_v28 = vpop.f32.mrb[33].mxu0 }
 0x5f7   :  { %1935 = vst [vmem:[%s3972_s10] sm:$0xff] %v1932_v27 }

</bundles_post_ra>
